<compile_context>
chip_gen: v7x
topology: tpu7x:2x2x1
jax: 0.10.0
libtpu: 0.0.40
codegen_flags: <defaults>
</compile_context>

<pallas_src>
import functools
import math

import jax
import jax.numpy as jnp
from jax.experimental import pallas as pl
from jax.experimental.pallas import tpu as pltpu

LN_EPS = 1e-5
NEG_BIAS = -1e9
_MIB = 1024 * 1024


def _layer_norm(x, gamma, beta):
    mu = jnp.mean(x, axis=-1, keepdims=True)
    var = jnp.mean(jnp.square(x - mu), axis=-1, keepdims=True)
    return (x - mu) * jax.lax.rsqrt(var + LN_EPS) * gamma + beta


# --------------------------------------------------------------------------- #
# Attention kernel: LayerNorm -> MHA (additive key bias) -> residual -> pad mask
# --------------------------------------------------------------------------- #
def _attn_kernel(x_ref, kbias_ref, pmask_ref, c_ref, wq_ref, wkv_ref, wo_ref,
                 out_ref, *rest, num_head, d_k, with_scores):
    if with_scores:
        scores_ref, xn_sc, k_sc, v_sc = rest
    else:
        scores_ref = None
        xn_sc, k_sc, v_sc = rest

    D = wq_ref.shape[0]
    T = x_ref.shape[1]
    tq = out_ref.shape[1]

    c = c_ref[...]                                   # (6, D): ln_g, ln_b, bq*s, bk, bv, bo
    g, be = c[0:1], c[1:2]
    bq, bk, bv, bo = c[2:3], c[3:4], c[4:5], c[5:6]

    # Per batch row (first query tile only): cache LayerNorm(x) and K/V projections.
    @pl.when(pl.program_id(1) == 0)
    def _():
        xf = x_ref[0]                                # (T, D) f32
        xfn = _layer_norm(xf, g, be).astype(jnp.bfloat16)
        xn_sc[...] = xfn
        kv = jnp.dot(xfn, wkv_ref[...], preferred_element_type=jnp.float32)  # (T, 2D)
        k_sc[...] = (kv[:, :D] + bk).astype(jnp.bfloat16)
        v_sc[...] = (kv[:, D:] + bv).astype(jnp.bfloat16)

    # Per query tile (sliced from the resident full-row block / scratch cache).
    qstart = pl.program_id(1) * tq
    if tq % 8 == 0:
        qstart = pl.multiple_of(qstart, 8)
    xq = x_ref[0, pl.ds(qstart, tq), :]              # (tq, D) f32 residual rows
    xqn = xn_sc[pl.ds(qstart, tq), :]                # (tq, D) bf16, already normalized

    # 1/sqrt(d_k) is folded into wq / bq host-side.
    q = jnp.dot(xqn, wq_ref[...], preferred_element_type=jnp.float32) + bq
    qb = q.astype(jnp.bfloat16)
    kb = k_sc[...]                                   # (T, D) bf16 cached keys
    vb = v_sc[...]                                   # (T, D) bf16 cached values

    kbias = jnp.broadcast_to(kbias_ref[0], (tq, T))  # broadcast once, reused per head

    ctx_parts = []
    for h in range(num_head):
        sl = slice(h * d_k, (h + 1) * d_k)
        s = jnp.einsum("qd,kd->qk", qb[:, sl], kb[:, sl],
                       preferred_element_type=jnp.float32) + kbias
        m = jnp.max(s, axis=-1, keepdims=True)
        e = jnp.exp(s - m)                           # f32 softmax (v5e: no bf16 EUP)
        p = e * pl.reciprocal(jnp.sum(e, axis=-1, keepdims=True), approx=True)
        if with_scores:
            scores_ref[0, h] = p.astype(scores_ref.dtype)   # lane-dense (tq, T)
        ctx_parts.append(jnp.dot(p.astype(jnp.bfloat16), vb[:, sl],
                                 preferred_element_type=jnp.float32))
    # One full-width output projection on the concatenated head contexts.
    ctx = jnp.concatenate(ctx_parts, axis=-1).astype(jnp.bfloat16)       # (tq, D)
    proj = jnp.dot(ctx, wo_ref[...], preferred_element_type=jnp.float32) + bo

    out_ref[0] = (proj + xq) * pmask_ref[0]          # dropout = identity (inference)


# --------------------------------------------------------------------------- #
# PosConvFF kernel: LayerNorm -> conv1 -> ReLU -> conv2 -> residual -> pad mask
# --------------------------------------------------------------------------- #
def _posconv_kernel(y_ref, pmask_ref, c_ref, b1_ref, w1_ref, w2_ref, out_ref,
                    xnp_sc, h_sc, *, ksize, pad):
    T = y_ref.shape[1]
    D = y_ref.shape[2]
    Dh = w1_ref.shape[2]
    tt = out_ref.shape[1]
    pad2 = 2 * pad
    hw = tt + pad2                                   # hidden halo-window rows

    c = c_ref[...]                                   # (3, D): ln_g, ln_b, b2
    g, be, b2 = c[0:1], c[1:2], c[2:3]

    # Per batch row (first time tile only): LayerNorm full row into a zero-padded cache.
    @pl.when(pl.program_id(1) == 0)
    def _():
        y = y_ref[0]                                 # (T, D) f32
        xn = _layer_norm(y, g, be).astype(jnp.bfloat16)
        if pad2 > 0:
            xnp_sc[0:pad2, :] = jnp.zeros((pad2, D), jnp.bfloat16)
            xnp_sc[pad2 + T:, :] = jnp.zeros((pad2, D), jnp.bfloat16)
        xnp_sc[pad2:pad2 + T, :] = xn

    t0 = pl.program_id(1) * tt
    if tt % 8 == 0:
        t0 = pl.multiple_of(t0, 8)

    # conv1 + ReLU over the halo window: K accumulated matmuls on shifted pl.ds views
    # (no unfold-by-concatenate operand materialization).
    hacc = jnp.broadcast_to(b1_ref[...], (hw, Dh))   # f32 accumulator
    for j in range(ksize):
        xs = xnp_sc[pl.ds(t0 + j, hw), :]            # (hw, D) bf16 shifted view
        hacc = hacc + jnp.dot(xs, w1_ref[j], preferred_element_type=jnp.float32)
    hr = jnp.maximum(hacc, 0.0)
    if pad > 0:
        # hidden rows whose global time index lies outside [0, T) are zero
        # (second conv's zero padding).
        row = (jax.lax.broadcasted_iota(jnp.int32, (hw, 1), 0)
               + (pl.program_id(1) * tt - pad))
        valid = jnp.logical_and(row >= 0, row < T).astype(jnp.float32)
        hr = hr * valid
    h_sc[...] = hr.astype(jnp.bfloat16)

    # conv2: K accumulated matmuls on shifted hidden views.
    zacc = jnp.broadcast_to(b2, (tt, D))             # f32 accumulator
    for j in range(ksize):
        zacc = zacc + jnp.dot(h_sc[j:j + tt, :], w2_ref[j],
                              preferred_element_type=jnp.float32)

    y_tile = y_ref[0, pl.ds(t0, tt), :]              # residual rows (f32)
    out_ref[0] = (zacc + y_tile) * pmask_ref[0]      # conv Dropout = identity


# --------------------------------------------------------------------------- #
# Generation-aware tiling helpers
# --------------------------------------------------------------------------- #
def _vmem_capacity_bytes():
    try:
        info = pltpu.get_tpu_info()
        cap = getattr(info, "vmem_capacity_bytes", None)
        if cap:
            return int(cap)
    except Exception:
        pass
    return 64 * _MIB                                 # conservative default (v7x-sized)


def _tile_candidates(T):
    cands = {T} | {t for t in (1024, 512, 384, 256, 128, 64, 32, 16, 8)
                   if t < T and T % t == 0}
    return sorted(cands, reverse=True)


def _pick_tile(T, budget, tile_bytes):
    cands = _tile_candidates(T)
    for t in cands:
        if tile_bytes(t) <= budget:
            return t
    return cands[-1]


def _attn_tile_bytes(tq, T, D, H, sbytes, with_scores):
    pipeline = 2 * (T * D * 4                        # resident full-row x block
                    + T * 4 + tq * 128 * 4           # key bias + pad-mask tile
                    + 8 * D * 4                      # stacked consts
                    + 4 * D * D * 2                  # wq + wkv + wo (bf16)
                    + tq * D * 4)                    # output tile
    if with_scores:
        pipeline += 2 * H * tq * T * sbytes          # double-buffered scores tile
    scratch = 3 * T * D * 2                          # xn / k / v caches (bf16)
    live = 2 * tq * T * 4 + 2 * tq * D * 4           # per-head score temporaries etc.
    return pipeline + scratch + live


def _posconv_tile_bytes(tt, T, D, Dh, K, pad):
    pipeline = 2 * (T * D * 4                        # resident full-row input
                    + tt * 128 * 4                   # pad-mask tile
                    + 4 * D * 4 + Dh * 4             # consts + b1
                    + 2 * K * D * Dh * 2             # w1 + w2 (bf16)
                    + tt * D * 4)                    # output tile
    scratch = (T + 4 * pad) * D * 2 + (tt + 2 * pad) * Dh * 2
    live = (tt + 2 * pad) * Dh * 4 + tt * D * 4      # f32 accumulators
    return pipeline + scratch + live


# --------------------------------------------------------------------------- #
# Wrapper
# --------------------------------------------------------------------------- #
def fft_block_forward(x, padding_mask, attn_mask, params, *,
                      q_tile=None, t_tile=None,
                      scores_dtype=jnp.bfloat16, return_scores=True):
    """FFTBlock forward: returns (out, attn_scores) (attn_scores=None if skipped)."""
    B, T, D = x.shape
    H = params["num_head"]
    d_k = D // H
    K = params["kernel_size"]
    assert K % 2 == 1, "same-padding conv path assumes odd kernel_size"
    pad = (K - 1) // 2
    Dh = params["w1"].shape[2]

    f32, bf16 = jnp.float32, jnp.bfloat16
    x = x.astype(f32)

    if padding_mask is None:
        padding_mask = jnp.ones((B, T), f32)
    # TODO(synk): attn_mask is treated as a pure key-padding mask broadcast over
    # query rows (standard FastSpeech usage); per-query structure (e.g. causal)
    # in a dense (B, T, T) mask is not supported by this O(B*T) key-bias path.
    if attn_mask is None:
        key_mask = jnp.ones((B, T), f32)
    else:
        key_mask = attn_mask[:, 0, :].astype(f32)
    kbias = ((1.0 - key_mask) * NEG_BIAS).reshape(B, 1, T)   # additive key bias
    pmask = padding_mask.astype(f32).reshape(B, T, 1)

    # Generation-aware VMEM budget: ~80% of physical VMEM (leave compiler headroom).
    cap = _vmem_capacity_bytes()
    vmem_limit = max(32 * _MIB, min(int(cap * 0.8), cap - 8 * _MIB))
    tile_budget = int(vmem_limit * 0.9)

    sbytes = jnp.dtype(scores_dtype).itemsize
    tq = q_tile if q_tile is not None else _pick_tile(
        T, tile_budget, lambda t: _attn_tile_bytes(t, T, D, H, sbytes, return_scores))
    assert T % tq == 0
    nq = T // tq

    scale = 1.0 / math.sqrt(d_k)
    # Stacked lane-dense constants; 1/sqrt(d_k) folded into bq (and wq below).
    c1 = jnp.concatenate([params["ln1_g"], params["ln1_b"],
                          params["bq"] * scale, params["bk"], params["bv"],
                          params["bo"]], axis=0).astype(f32)                 # (6, D)
    wq = (params["wq"] * scale).astype(bf16)                                 # (D, D)
    wkv = jnp.concatenate([params["wk"], params["wv"]], axis=1).astype(bf16)  # (D, 2D)
    wo = params["wo"].astype(bf16)

    attn_cost = pl.CostEstimate(
        flops=int(8 * B * T * D * D + 4 * B * T * T * D),
        transcendentals=int(B * H * T * T),
        bytes_accessed=int(2 * B * T * D * 4 + 4 * D * D * 2 + 2 * B * T * 4
                           + (B * H * T * T * sbytes if return_scores else 0)))

    full2 = lambda b, q: (0, 0)
    out_specs = pl.BlockSpec((1, tq, D), lambda b, q: (b, q, 0))
    out_shape = jax.ShapeDtypeStruct((B, T, D), f32)
    if return_scores:
        out_specs = (out_specs,
                     pl.BlockSpec((1, H, tq, T), lambda b, q: (b, 0, q, 0)))
        out_shape = (out_shape,
                     jax.ShapeDtypeStruct((B, H, T, T), scores_dtype))

    attn_call = pl.pallas_call(
        functools.partial(_attn_kernel, num_head=H, d_k=d_k,
                          with_scores=return_scores),
        out_shape=out_shape,
        grid=(B, nq),
        in_specs=[pl.BlockSpec((1, T, D), lambda b, q: (b, 0, 0)),   # x (full row)
                  pl.BlockSpec((1, 1, T), lambda b, q: (b, 0, 0)),   # key bias
                  pl.BlockSpec((1, tq, 1), lambda b, q: (b, q, 0)),  # pad mask
                  pl.BlockSpec((6, D), full2),                       # stacked consts
                  pl.BlockSpec((D, D), full2),                       # wq (scaled)
                  pl.BlockSpec((D, 2 * D), full2),                   # wk|wv stacked
                  pl.BlockSpec((D, D), full2)],                      # wo
        out_specs=out_specs,
        scratch_shapes=[pltpu.VMEM((T, D), bf16),    # LayerNorm(x) cache
                        pltpu.VMEM((T, D), bf16),    # K cache
                        pltpu.VMEM((T, D), bf16)],   # V cache
        compiler_params=pltpu.CompilerParams(
            dimension_semantics=("parallel", "arbitrary"),   # K/V cached across q tiles
            vmem_limit_bytes=vmem_limit),
        cost_estimate=attn_cost,
    )
    res = attn_call(x, kbias, pmask, c1, wq, wkv, wo)
    if return_scores:
        attn_out, attn_scores = res
    else:
        attn_out, attn_scores = res, None

    # ---- position-wise conv feed-forward -------------------------------------
    tt = t_tile if t_tile is not None else _pick_tile(
        T, tile_budget, lambda t: _posconv_tile_bytes(t, T, D, Dh, K, pad))
    assert T % tt == 0
    nt = T // tt

    c2 = jnp.concatenate([params["ln2_g"], params["ln2_b"], params["b2"]],
                         axis=0).astype(f32)                                 # (3, D)
    w1 = params["w1"].astype(bf16)                                           # (K, D, Dh)
    w2 = params["w2"].astype(bf16)                                           # (K, Dh, D)
    b1 = params["b1"].astype(f32)                                            # (1, Dh)

    pc_cost = pl.CostEstimate(
        flops=int(4 * B * T * K * D * Dh),
        transcendentals=0,
        bytes_accessed=int(2 * B * T * D * 4 + 2 * K * D * Dh * 2 + B * T * 4))

    full_pc = lambda b, t: (0, 0)
    posconv_call = pl.pallas_call(
        functools.partial(_posconv_kernel, ksize=K, pad=pad),
        out_shape=jax.ShapeDtypeStruct((B, T, D), f32),
        grid=(B, nt),
        in_specs=[pl.BlockSpec((1, T, D), lambda b, t: (b, 0, 0)),   # attn out (full row)
                  pl.BlockSpec((1, tt, 1), lambda b, t: (b, t, 0)),  # pad mask
                  pl.BlockSpec((3, D), full_pc),                     # ln2_g, ln2_b, b2
                  pl.BlockSpec((1, Dh), full_pc),                    # b1
                  pl.BlockSpec((K, D, Dh), lambda b, t: (0, 0, 0)),  # w1 (per-tap)
                  pl.BlockSpec((K, Dh, D), lambda b, t: (0, 0, 0))], # w2 (per-tap)
        out_specs=pl.BlockSpec((1, tt, D), lambda b, t: (b, t, 0)),
        scratch_shapes=[pltpu.VMEM((T + 4 * pad, D), bf16),   # zero-padded LN(x) cache
                        pltpu.VMEM((tt + 2 * pad, Dh), bf16)],  # hidden halo window
        compiler_params=pltpu.CompilerParams(
            dimension_semantics=("parallel", "arbitrary"),
            vmem_limit_bytes=vmem_limit),
        cost_estimate=pc_cost,
    )
    # TODO(synk): attention and posconv remain separate pallas_calls because the conv
    # needs a (K-1)-row time halo across attention query tiles; a fused full-row
    # variant would fit only on 128 MiB parts (v5e/v6e).
    out = posconv_call(attn_out, pmask, c2, b1, w1, w2)
    return out, attn_scores


if __name__ == "__main__":
    # small shapes: batch=2, seq=8, d_model=32, num_head=4, d_inner=64, kernel=3
    B, T, D, H, Dh, K = 2, 8, 32, 4, 64, 3
    key = jax.random.PRNGKey(0)
    ks = jax.random.split(key, 16)
    s = 0.1

    # deterministic synthetic parameters (weights stored as (in, out) / (K, in, out))
    params = {
        "num_head": H, "kernel_size": K,
        "ln1_g": jnp.ones((1, D), jnp.float32), "ln1_b": jnp.zeros((1, D), jnp.float32),
        "ln2_g": jnp.ones((1, D), jnp.float32), "ln2_b": jnp.zeros((1, D), jnp.float32),
        "wq": s * jax.random.normal(ks[0], (D, D), jnp.float32),
        "bq": s * jax.random.normal(ks[1], (1, D), jnp.float32),
        "wk": s * jax.random.normal(ks[2], (D, D), jnp.float32),
        "bk": s * jax.random.normal(ks[3], (1, D), jnp.float32),
        "wv": s * jax.random.normal(ks[4], (D, D), jnp.float32),
        "bv": s * jax.random.normal(ks[5], (1, D), jnp.float32),
        "wo": s * jax.random.normal(ks[6], (D, D), jnp.float32),
        "bo": s * jax.random.normal(ks[7], (1, D), jnp.float32),
        "w1": s * jax.random.normal(ks[8], (K, D, Dh), jnp.float32),
        "b1": s * jax.random.normal(ks[9], (1, Dh), jnp.float32),
        "w2": s * jax.random.normal(ks[10], (K, Dh, D), jnp.float32),
        "b2": s * jax.random.normal(ks[11], (1, D), jnp.float32),
    }

    x = jax.random.normal(ks[12], (B, T, D), jnp.float32)
    lengths = jnp.array([8, 5], jnp.int32)                       # per-batch valid lengths
    padding_mask = (jnp.arange(T)[None, :] < lengths[:, None]).astype(jnp.float32)  # (B, T)
    # attn_mask: 1 = attend to key position, 0 = masked (key positions beyond length)
    attn_mask = jnp.broadcast_to(padding_mask[:, None, :], (B, T, T))

    # TODO(synk): MultiHeadAttention source not provided; a standard QKV-projection
    # scaled-dot-product MHA (mask==0 -> -inf before softmax) is assumed.
    out, attn_scores = fft_block_forward(x, padding_mask, attn_mask, params)
    jax.block_until_ready((out, attn_scores))
    assert out.shape == (B, T, D) and attn_scores.shape == (B, H, T, T)

    # fast path: skip materializing the (B, H, T, T) attention scores entirely
    out_ns, _ = fft_block_forward(x, padding_mask, attn_mask, params,
                                  return_scores=False)
    jax.block_until_ready(out_ns)
    assert out_ns.shape == (B, T, D)
    print("KERNEL_OK")
</pallas_src>

<mosaic_0001>
module attributes {stable_mosaic.version = 11 : i64} {
  func.func @_attn_kernel(%arg0: i32, %arg1: i32, %arg2: memref<1x8x32xf32, #tpu.memory_space<vmem>>, %arg3: memref<1x1x8xf32, #tpu.memory_space<vmem>>, %arg4: memref<1x8x1xf32, #tpu.memory_space<vmem>>, %arg5: memref<6x32xf32, #tpu.memory_space<vmem>>, %arg6: memref<32x32xbf16, #tpu.memory_space<vmem>>, %arg7: memref<32x64xbf16, #tpu.memory_space<vmem>>, %arg8: memref<32x32xbf16, #tpu.memory_space<vmem>>, %arg9: memref<1x8x32xf32, #tpu.memory_space<vmem>>, %arg10: memref<1x4x8x8xbf16, #tpu.memory_space<vmem>>, %arg11: memref<8x32xbf16, #tpu.memory_space<vmem>>, %arg12: memref<8x32xbf16, #tpu.memory_space<vmem>>, %arg13: memref<8x32xbf16, #tpu.memory_space<vmem>>) attributes {dimension_semantics = [#tpu.dimension_semantics<parallel>, #tpu.dimension_semantics<arbitrary>], iteration_bounds = array<i64: 2, 1>, scalar_prefetch = 0 : i64, scratch_operands = 3 : i64, tpu.core_type = #tpu.core_type<tc>, window_params = [{transform_indices = @transform_0, window_bounds = array<i64: 1, 8, 32>}, {transform_indices = @transform_1, window_bounds = array<i64: 1, 1, 8>}, {transform_indices = @transform_2, window_bounds = array<i64: 1, 8, 1>}, {pipeline_mode = #tpu.pipeline_mode<synchronous>, transform_indices = @transform_3, window_bounds = array<i64: 6, 32>}, {pipeline_mode = #tpu.pipeline_mode<synchronous>, transform_indices = @transform_4, window_bounds = array<i64: 32, 32>}, {pipeline_mode = #tpu.pipeline_mode<synchronous>, transform_indices = @transform_5, window_bounds = array<i64: 32, 64>}, {pipeline_mode = #tpu.pipeline_mode<synchronous>, transform_indices = @transform_6, window_bounds = array<i64: 32, 32>}, {transform_indices = @transform_7, window_bounds = array<i64: 1, 8, 32>}, {transform_indices = @transform_8, window_bounds = array<i64: 1, 4, 8, 8>}]} {
    %c0 = arith.constant 0 : index
    %c0_0 = arith.constant 0 : index
    %0 = vector.load %arg5[%c0, %c0_0] : memref<6x32xf32, #tpu.memory_space<vmem>>, vector<6x32xf32>
    %1 = vector.extract_strided_slice %0 {offsets = [0, 0], sizes = [1, 32], strides = [1, 1]} : vector<6x32xf32> to vector<1x32xf32>
    %2 = vector.extract_strided_slice %0 {offsets = [1, 0], sizes = [1, 32], strides = [1, 1]} : vector<6x32xf32> to vector<1x32xf32>
    %3 = vector.extract_strided_slice %0 {offsets = [2, 0], sizes = [1, 32], strides = [1, 1]} : vector<6x32xf32> to vector<1x32xf32>
    %4 = vector.extract_strided_slice %0 {offsets = [3, 0], sizes = [1, 32], strides = [1, 1]} : vector<6x32xf32> to vector<1x32xf32>
    %5 = vector.extract_strided_slice %0 {offsets = [4, 0], sizes = [1, 32], strides = [1, 1]} : vector<6x32xf32> to vector<1x32xf32>
    %6 = vector.extract_strided_slice %0 {offsets = [5, 0], sizes = [1, 32], strides = [1, 1]} : vector<6x32xf32> to vector<1x32xf32>
    %c0_i32 = arith.constant 0 : i32
    %7 = arith.cmpi eq, %arg1, %c0_i32 : i32
    %8 = arith.extui %7 : i1 to i32
    %c0_i32_1 = arith.constant 0 : i32
    %9 = arith.cmpi ne, %8, %c0_i32_1 : i32
    scf.if %9 {
      %c0_52 = arith.constant 0 : index
      %c0_53 = arith.constant 0 : index
      %c0_54 = arith.constant 0 : index
      %126 = vector.load %arg2[%c0_52, %c0_53, %c0_54] : memref<1x8x32xf32, #tpu.memory_space<vmem>>, vector<1x8x32xf32>
      %127 = vector.shape_cast %126 : vector<1x8x32xf32> to vector<8x32xf32>
      %cst_55 = arith.constant dense<0.000000e+00> : vector<8xf32>
      %128 = vector.multi_reduction <add>, %127, %cst_55 [1] : vector<8x32xf32> to vector<8xf32>
      %129 = vector.shape_cast %128 : vector<8xf32> to vector<8x1xf32>
      %cst_56 = arith.constant 3.200000e+01 : f32
      %130 = vector.broadcast %cst_56 : f32 to vector<8x1xf32>
      %131 = arith.divf %129, %130 : vector<8x1xf32>
      %132 = vector.broadcast %131 : vector<8x1xf32> to vector<8x32xf32>
      %133 = arith.subf %127, %132 : vector<8x32xf32>
      %134 = arith.mulf %133, %133 : vector<8x32xf32>
      %cst_57 = arith.constant dense<0.000000e+00> : vector<8xf32>
      %135 = vector.multi_reduction <add>, %134, %cst_57 [1] : vector<8x32xf32> to vector<8xf32>
      %136 = vector.shape_cast %135 : vector<8xf32> to vector<8x1xf32>
      %cst_58 = arith.constant 3.200000e+01 : f32
      %137 = vector.broadcast %cst_58 : f32 to vector<8x1xf32>
      %138 = arith.divf %136, %137 : vector<8x1xf32>
      %139 = vector.broadcast %131 : vector<8x1xf32> to vector<8x32xf32>
      %140 = arith.subf %127, %139 : vector<8x32xf32>
      %cst_59 = arith.constant 9.99999974E-6 : f32
      %141 = vector.broadcast %cst_59 : f32 to vector<8x1xf32>
      %142 = arith.addf %138, %141 : vector<8x1xf32>
      %143 = math.rsqrt %142 : vector<8x1xf32>
      %144 = vector.broadcast %143 : vector<8x1xf32> to vector<8x32xf32>
      %145 = arith.mulf %140, %144 : vector<8x32xf32>
      %146 = vector.broadcast %1 : vector<1x32xf32> to vector<8x32xf32>
      %147 = arith.mulf %145, %146 : vector<8x32xf32>
      %148 = vector.broadcast %2 : vector<1x32xf32> to vector<8x32xf32>
      %149 = arith.addf %147, %148 : vector<8x32xf32>
      %150 = arith.truncf %149 : vector<8x32xf32> to vector<8x32xbf16>
      %c0_60 = arith.constant 0 : index
      %c0_61 = arith.constant 0 : index
      %151 = vector.load %arg11[%c0_60, %c0_61] : memref<8x32xbf16, #tpu.memory_space<vmem>>, vector<8x32xbf16>
      tpu.vector_store %arg11[%c0_60, %c0_61], %150 {strides = array<i32>} : memref<8x32xbf16, #tpu.memory_space<vmem>>, vector<8x32xbf16>,
      %c0_62 = arith.constant 0 : index
      %c0_63 = arith.constant 0 : index
      %152 = vector.load %arg7[%c0_62, %c0_63] : memref<32x64xbf16, #tpu.memory_space<vmem>>, vector<32x64xbf16>
      %cst_64 = arith.constant dense<0.000000e+00> : vector<8x64xf32>
      %153 = tpu.matmul %150, %152, %cst_64 {dimension_numbers = #tpu.dot_dimension_numbers<[1], [0], [0], [1], [0, 0, 1, 1], [], []>} : vector<8x32xbf16>, vector<32x64xbf16>, vector<8x64xf32> -> vector<8x64xf32>
      %154 = vector.extract_strided_slice %153 {offsets = [0, 0], sizes = [8, 32], strides = [1, 1]} : vector<8x64xf32> to vector<8x32xf32>
      %155 = vector.broadcast %4 : vector<1x32xf32> to vector<8x32xf32>
      %156 = arith.addf %154, %155 : vector<8x32xf32>
      %157 = arith.truncf %156 : vector<8x32xf32> to vector<8x32xbf16>
      %c0_65 = arith.constant 0 : index
      %c0_66 = arith.constant 0 : index
      %158 = vector.load %arg12[%c0_65, %c0_66] : memref<8x32xbf16, #tpu.memory_space<vmem>>, vector<8x32xbf16>
      tpu.vector_store %arg12[%c0_65, %c0_66], %157 {strides = array<i32>} : memref<8x32xbf16, #tpu.memory_space<vmem>>, vector<8x32xbf16>,
      %159 = vector.extract_strided_slice %153 {offsets = [0, 32], sizes = [8, 32], strides = [1, 1]} : vector<8x64xf32> to vector<8x32xf32>
      %160 = vector.broadcast %5 : vector<1x32xf32> to vector<8x32xf32>
      %161 = arith.addf %159, %160 : vector<8x32xf32>
      %162 = arith.truncf %161 : vector<8x32xf32> to vector<8x32xbf16>
      %c0_67 = arith.constant 0 : index
      %c0_68 = arith.constant 0 : index
      %163 = vector.load %arg13[%c0_67, %c0_68] : memref<8x32xbf16, #tpu.memory_space<vmem>>, vector<8x32xbf16>
      tpu.vector_store %arg13[%c0_67, %c0_68], %162 {strides = array<i32>} : memref<8x32xbf16, #tpu.memory_space<vmem>>, vector<8x32xbf16>,
    } else {
    }
    %c8_i32 = arith.constant 8 : i32
    %10 = arith.muli %arg1, %c8_i32 : i32
    %11 = tpu.assume_multiple %10, 8 : i32
    %c0_2 = arith.constant 0 : index
    %12 = arith.index_cast %11 : i32 to index
    %c0_3 = arith.constant 0 : index
    %13 = vector.load %arg2[%c0_2, %12, %c0_3] : memref<1x8x32xf32, #tpu.memory_space<vmem>>, vector<1x8x32xf32>
    %14 = vector.shape_cast %13 : vector<1x8x32xf32> to vector<8x32xf32>
    %15 = arith.index_cast %11 : i32 to index
    %c0_4 = arith.constant 0 : index
    %16 = vector.load %arg11[%15, %c0_4] : memref<8x32xbf16, #tpu.memory_space<vmem>>, vector<8x32xbf16>
    %c0_5 = arith.constant 0 : index
    %c0_6 = arith.constant 0 : index
    %17 = vector.load %arg6[%c0_5, %c0_6] : memref<32x32xbf16, #tpu.memory_space<vmem>>, vector<32x32xbf16>
    %cst = arith.constant dense<0.000000e+00> : vector<8x32xf32>
    %18 = tpu.matmul %16, %17, %cst {dimension_numbers = #tpu.dot_dimension_numbers<[1], [0], [0], [1], [0, 0, 1, 1], [], []>} : vector<8x32xbf16>, vector<32x32xbf16>, vector<8x32xf32> -> vector<8x32xf32>
    %19 = vector.broadcast %3 : vector<1x32xf32> to vector<8x32xf32>
    %20 = arith.addf %18, %19 : vector<8x32xf32>
    %21 = arith.truncf %20 : vector<8x32xf32> to vector<8x32xbf16>
    %c0_7 = arith.constant 0 : index
    %c0_8 = arith.constant 0 : index
    %22 = vector.load %arg12[%c0_7, %c0_8] : memref<8x32xbf16, #tpu.memory_space<vmem>>, vector<8x32xbf16>
    %c0_9 = arith.constant 0 : index
    %c0_10 = arith.constant 0 : index
    %23 = vector.load %arg13[%c0_9, %c0_10] : memref<8x32xbf16, #tpu.memory_space<vmem>>, vector<8x32xbf16>
    %c0_11 = arith.constant 0 : index
    %c0_12 = arith.constant 0 : index
    %c0_13 = arith.constant 0 : index
    %24 = vector.load %arg3[%c0_11, %c0_12, %c0_13] : memref<1x1x8xf32, #tpu.memory_space<vmem>>, vector<1x1x8xf32>
    %25 = vector.shape_cast %24 : vector<1x1x8xf32> to vector<1x8xf32>
    %26 = vector.shape_cast %25 : vector<1x8xf32> to vector<1x8xf32>
    %27 = vector.broadcast %26 : vector<1x8xf32> to vector<8x8xf32>
    %28 = vector.extract_strided_slice %21 {offsets = [0, 0], sizes = [8, 8], strides = [1, 1]} : vector<8x32xbf16> to vector<8x8xbf16>
    %29 = vector.extract_strided_slice %22 {offsets = [0, 0], sizes = [8, 8], strides = [1, 1]} : vector<8x32xbf16> to vector<8x8xbf16>
    "tpu.trace_start"() <{level = 10 : i32, message = "qd,kd->qk"}> : () -> ()
    %cst_14 = arith.constant dense<0.000000e+00> : vector<8x8xf32>
    %30 = tpu.matmul %28, %29, %cst_14 {dimension_numbers = #tpu.dot_dimension_numbers<[1], [1], [0], [0], [0, 0, 1, 0], [], []>} : vector<8x8xbf16>, vector<8x8xbf16>, vector<8x8xf32> -> vector<8x8xf32>
    "tpu.trace_stop"() : () -> ()
    %31 = arith.addf %30, %27 : vector<8x8xf32>
    %cst_15 = arith.constant dense<0xFF800000> : vector<8xf32>
    %32 = vector.multi_reduction <maximumf>, %31, %cst_15 [1] : vector<8x8xf32> to vector<8xf32>
    %33 = vector.shape_cast %32 : vector<8xf32> to vector<8x1xf32>
    %34 = vector.broadcast %33 : vector<8x1xf32> to vector<8x8xf32>
    %35 = arith.subf %31, %34 : vector<8x8xf32>
    %36 = math.exp %35 : vector<8x8xf32>
    %cst_16 = arith.constant dense<0.000000e+00> : vector<8xf32>
    %37 = vector.multi_reduction <add>, %36, %cst_16 [1] : vector<8x8xf32> to vector<8xf32>
    %38 = vector.shape_cast %37 : vector<8xf32> to vector<8x1xf32>
    %39 = tpu.reciprocal %38 {approx = true} : vector<8x1xf32> -> vector<8x1xf32>
    %40 = vector.broadcast %39 : vector<8x1xf32> to vector<8x8xf32>
    %41 = arith.mulf %36, %40 : vector<8x8xf32>
    %42 = arith.truncf %41 : vector<8x8xf32> to vector<8x8xbf16>
    %c0_17 = arith.constant 0 : index
    %c0_18 = arith.constant 0 : index
    %c0_19 = arith.constant 0 : index
    %c0_20 = arith.constant 0 : index
    %43 = vector.load %arg10[%c0_17, %c0_18, %c0_19, %c0_20] : memref<1x4x8x8xbf16, #tpu.memory_space<vmem>>, vector<1x1x8x8xbf16>
    %44 = vector.shape_cast %43 : vector<1x1x8x8xbf16> to vector<8x8xbf16>
    %45 = vector.shape_cast %42 : vector<8x8xbf16> to vector<1x1x8x8xbf16>
    tpu.vector_store %arg10[%c0_17, %c0_18, %c0_19, %c0_20], %45 {strides = array<i32>} : memref<1x4x8x8xbf16, #tpu.memory_space<vmem>>, vector<1x1x8x8xbf16>,
    %46 = arith.truncf %41 : vector<8x8xf32> to vector<8x8xbf16>
    %47 = vector.extract_strided_slice %23 {offsets = [0, 0], sizes = [8, 8], strides = [1, 1]} : vector<8x32xbf16> to vector<8x8xbf16>
    %cst_21 = arith.constant dense<0.000000e+00> : vector<8x8xf32>
    %48 = tpu.matmul %46, %47, %cst_21 {dimension_numbers = #tpu.dot_dimension_numbers<[1], [0], [0], [1], [0, 0, 1, 1], [], []>} : vector<8x8xbf16>, vector<8x8xbf16>, vector<8x8xf32> -> vector<8x8xf32>
    %49 = vector.extract_strided_slice %21 {offsets = [0, 8], sizes = [8, 8], strides = [1, 1]} : vector<8x32xbf16> to vector<8x8xbf16>
    %50 = vector.extract_strided_slice %22 {offsets = [0, 8], sizes = [8, 8], strides = [1, 1]} : vector<8x32xbf16> to vector<8x8xbf16>
    "tpu.trace_start"() <{level = 10 : i32, message = "qd,kd->qk"}> : () -> ()
    %cst_22 = arith.constant dense<0.000000e+00> : vector<8x8xf32>
    %51 = tpu.matmul %49, %50, %cst_22 {dimension_numbers = #tpu.dot_dimension_numbers<[1], [1], [0], [0], [0, 0, 1, 0], [], []>} : vector<8x8xbf16>, vector<8x8xbf16>, vector<8x8xf32> -> vector<8x8xf32>
    "tpu.trace_stop"() : () -> ()
    %52 = arith.addf %51, %27 : vector<8x8xf32>
    %cst_23 = arith.constant dense<0xFF800000> : vector<8xf32>
    %53 = vector.multi_reduction <maximumf>, %52, %cst_23 [1] : vector<8x8xf32> to vector<8xf32>
    %54 = vector.shape_cast %53 : vector<8xf32> to vector<8x1xf32>
    %55 = vector.broadcast %54 : vector<8x1xf32> to vector<8x8xf32>
    %56 = arith.subf %52, %55 : vector<8x8xf32>
    %57 = math.exp %56 : vector<8x8xf32>
    %cst_24 = arith.constant dense<0.000000e+00> : vector<8xf32>
    %58 = vector.multi_reduction <add>, %57, %cst_24 [1] : vector<8x8xf32> to vector<8xf32>
    %59 = vector.shape_cast %58 : vector<8xf32> to vector<8x1xf32>
    %60 = tpu.reciprocal %59 {approx = true} : vector<8x1xf32> -> vector<8x1xf32>
    %61 = vector.broadcast %60 : vector<8x1xf32> to vector<8x8xf32>
    %62 = arith.mulf %57, %61 : vector<8x8xf32>
    %63 = arith.truncf %62 : vector<8x8xf32> to vector<8x8xbf16>
    %c0_25 = arith.constant 0 : index
    %c1 = arith.constant 1 : index
    %c0_26 = arith.constant 0 : index
    %c0_27 = arith.constant 0 : index
    %64 = vector.load %arg10[%c0_25, %c1, %c0_26, %c0_27] : memref<1x4x8x8xbf16, #tpu.memory_space<vmem>>, vector<1x1x8x8xbf16>
    %65 = vector.shape_cast %64 : vector<1x1x8x8xbf16> to vector<8x8xbf16>
    %66 = vector.shape_cast %63 : vector<8x8xbf16> to vector<1x1x8x8xbf16>
    tpu.vector_store %arg10[%c0_25, %c1, %c0_26, %c0_27], %66 {strides = array<i32>} : memref<1x4x8x8xbf16, #tpu.memory_space<vmem>>, vector<1x1x8x8xbf16>,
    %67 = arith.truncf %62 : vector<8x8xf32> to vector<8x8xbf16>
    %68 = vector.extract_strided_slice %23 {offsets = [0, 8], sizes = [8, 8], strides = [1, 1]} : vector<8x32xbf16> to vector<8x8xbf16>
    %cst_28 = arith.constant dense<0.000000e+00> : vector<8x8xf32>
    %69 = tpu.matmul %67, %68, %cst_28 {dimension_numbers = #tpu.dot_dimension_numbers<[1], [0], [0], [1], [0, 0, 1, 1], [], []>} : vector<8x8xbf16>, vector<8x8xbf16>, vector<8x8xf32> -> vector<8x8xf32>
    %70 = vector.extract_strided_slice %21 {offsets = [0, 16], sizes = [8, 8], strides = [1, 1]} : vector<8x32xbf16> to vector<8x8xbf16>
    %71 = vector.extract_strided_slice %22 {offsets = [0, 16], sizes = [8, 8], strides = [1, 1]} : vector<8x32xbf16> to vector<8x8xbf16>
    "tpu.trace_start"() <{level = 10 : i32, message = "qd,kd->qk"}> : () -> ()
    %cst_29 = arith.constant dense<0.000000e+00> : vector<8x8xf32>
    %72 = tpu.matmul %70, %71, %cst_29 {dimension_numbers = #tpu.dot_dimension_numbers<[1], [1], [0], [0], [0, 0, 1, 0], [], []>} : vector<8x8xbf16>, vector<8x8xbf16>, vector<8x8xf32> -> vector<8x8xf32>
    "tpu.trace_stop"() : () -> ()
    %73 = arith.addf %72, %27 : vector<8x8xf32>
    %cst_30 = arith.constant dense<0xFF800000> : vector<8xf32>
    %74 = vector.multi_reduction <maximumf>, %73, %cst_30 [1] : vector<8x8xf32> to vector<8xf32>
    %75 = vector.shape_cast %74 : vector<8xf32> to vector<8x1xf32>
    %76 = vector.broadcast %75 : vector<8x1xf32> to vector<8x8xf32>
    %77 = arith.subf %73, %76 : vector<8x8xf32>
    %78 = math.exp %77 : vector<8x8xf32>
    %cst_31 = arith.constant dense<0.000000e+00> : vector<8xf32>
    %79 = vector.multi_reduction <add>, %78, %cst_31 [1] : vector<8x8xf32> to vector<8xf32>
    %80 = vector.shape_cast %79 : vector<8xf32> to vector<8x1xf32>
    %81 = tpu.reciprocal %80 {approx = true} : vector<8x1xf32> -> vector<8x1xf32>
    %82 = vector.broadcast %81 : vector<8x1xf32> to vector<8x8xf32>
    %83 = arith.mulf %78, %82 : vector<8x8xf32>
    %84 = arith.truncf %83 : vector<8x8xf32> to vector<8x8xbf16>
    %c0_32 = arith.constant 0 : index
    %c2 = arith.constant 2 : index
    %c0_33 = arith.constant 0 : index
    %c0_34 = arith.constant 0 : index
    %85 = vector.load %arg10[%c0_32, %c2, %c0_33, %c0_34] : memref<1x4x8x8xbf16, #tpu.memory_space<vmem>>, vector<1x1x8x8xbf16>
    %86 = vector.shape_cast %85 : vector<1x1x8x8xbf16> to vector<8x8xbf16>
    %87 = vector.shape_cast %84 : vector<8x8xbf16> to vector<1x1x8x8xbf16>
    tpu.vector_store %arg10[%c0_32, %c2, %c0_33, %c0_34], %87 {strides = array<i32>} : memref<1x4x8x8xbf16, #tpu.memory_space<vmem>>, vector<1x1x8x8xbf16>,
    %88 = arith.truncf %83 : vector<8x8xf32> to vector<8x8xbf16>
    %89 = vector.extract_strided_slice %23 {offsets = [0, 16], sizes = [8, 8], strides = [1, 1]} : vector<8x32xbf16> to vector<8x8xbf16>
    %cst_35 = arith.constant dense<0.000000e+00> : vector<8x8xf32>
    %90 = tpu.matmul %88, %89, %cst_35 {dimension_numbers = #tpu.dot_dimension_numbers<[1], [0], [0], [1], [0, 0, 1, 1], [], []>} : vector<8x8xbf16>, vector<8x8xbf16>, vector<8x8xf32> -> vector<8x8xf32>
    %91 = vector.extract_strided_slice %21 {offsets = [0, 24], sizes = [8, 8], strides = [1, 1]} : vector<8x32xbf16> to vector<8x8xbf16>
    %92 = vector.extract_strided_slice %22 {offsets = [0, 24], sizes = [8, 8], strides = [1, 1]} : vector<8x32xbf16> to vector<8x8xbf16>
    "tpu.trace_start"() <{level = 10 : i32, message = "qd,kd->qk"}> : () -> ()
    %cst_36 = arith.constant dense<0.000000e+00> : vector<8x8xf32>
    %93 = tpu.matmul %91, %92, %cst_36 {dimension_numbers = #tpu.dot_dimension_numbers<[1], [1], [0], [0], [0, 0, 1, 0], [], []>} : vector<8x8xbf16>, vector<8x8xbf16>, vector<8x8xf32> -> vector<8x8xf32>
    "tpu.trace_stop"() : () -> ()
    %94 = arith.addf %93, %27 : vector<8x8xf32>
    %cst_37 = arith.constant dense<0xFF800000> : vector<8xf32>
    %95 = vector.multi_reduction <maximumf>, %94, %cst_37 [1] : vector<8x8xf32> to vector<8xf32>
    %96 = vector.shape_cast %95 : vector<8xf32> to vector<8x1xf32>
    %97 = vector.broadcast %96 : vector<8x1xf32> to vector<8x8xf32>
    %98 = arith.subf %94, %97 : vector<8x8xf32>
    %99 = math.exp %98 : vector<8x8xf32>
    %cst_38 = arith.constant dense<0.000000e+00> : vector<8xf32>
    %100 = vector.multi_reduction <add>, %99, %cst_38 [1] : vector<8x8xf32> to vector<8xf32>
    %101 = vector.shape_cast %100 : vector<8xf32> to vector<8x1xf32>
    %102 = tpu.reciprocal %101 {approx = true} : vector<8x1xf32> -> vector<8x1xf32>
    %103 = vector.broadcast %102 : vector<8x1xf32> to vector<8x8xf32>
    %104 = arith.mulf %99, %103 : vector<8x8xf32>
    %105 = arith.truncf %104 : vector<8x8xf32> to vector<8x8xbf16>
    %c0_39 = arith.constant 0 : index
    %c3 = arith.constant 3 : index
    %c0_40 = arith.constant 0 : index
    %c0_41 = arith.constant 0 : index
    %106 = vector.load %arg10[%c0_39, %c3, %c0_40, %c0_41] : memref<1x4x8x8xbf16, #tpu.memory_space<vmem>>, vector<1x1x8x8xbf16>
    %107 = vector.shape_cast %106 : vector<1x1x8x8xbf16> to vector<8x8xbf16>
    %108 = vector.shape_cast %105 : vector<8x8xbf16> to vector<1x1x8x8xbf16>
    tpu.vector_store %arg10[%c0_39, %c3, %c0_40, %c0_41], %108 {strides = array<i32>} : memref<1x4x8x8xbf16, #tpu.memory_space<vmem>>, vector<1x1x8x8xbf16>,
    %109 = arith.truncf %104 : vector<8x8xf32> to vector<8x8xbf16>
    %110 = vector.extract_strided_slice %23 {offsets = [0, 24], sizes = [8, 8], strides = [1, 1]} : vector<8x32xbf16> to vector<8x8xbf16>
    %cst_42 = arith.constant dense<0.000000e+00> : vector<8x8xf32>
    %111 = tpu.matmul %109, %110, %cst_42 {dimension_numbers = #tpu.dot_dimension_numbers<[1], [0], [0], [1], [0, 0, 1, 1], [], []>} : vector<8x8xbf16>, vector<8x8xbf16>, vector<8x8xf32> -> vector<8x8xf32>
    %112 = tpu.concatenate %48, %69, %90, %111 in 1 : vector<8x8xf32>, vector<8x8xf32>, vector<8x8xf32>, vector<8x8xf32> -> vector<8x32xf32>
    %113 = arith.truncf %112 : vector<8x32xf32> to vector<8x32xbf16>
    %c0_43 = arith.constant 0 : index
    %c0_44 = arith.constant 0 : index
    %114 = vector.load %arg8[%c0_43, %c0_44] : memref<32x32xbf16, #tpu.memory_space<vmem>>, vector<32x32xbf16>
    %cst_45 = arith.constant dense<0.000000e+00> : vector<8x32xf32>
    %115 = tpu.matmul %113, %114, %cst_45 {dimension_numbers = #tpu.dot_dimension_numbers<[1], [0], [0], [1], [0, 0, 1, 1], [], []>} : vector<8x32xbf16>, vector<32x32xbf16>, vector<8x32xf32> -> vector<8x32xf32>
    %116 = vector.broadcast %6 : vector<1x32xf32> to vector<8x32xf32>
    %117 = arith.addf %115, %116 : vector<8x32xf32>
    %118 = arith.addf %117, %14 : vector<8x32xf32>
    %c0_46 = arith.constant 0 : index
    %c0_47 = arith.constant 0 : index
    %c0_48 = arith.constant 0 : index
    %119 = vector.load %arg4[%c0_46, %c0_47, %c0_48] : memref<1x8x1xf32, #tpu.memory_space<vmem>>, vector<1x8x1xf32>
    %120 = vector.shape_cast %119 : vector<1x8x1xf32> to vector<8x1xf32>
    %121 = vector.broadcast %120 : vector<8x1xf32> to vector<8x32xf32>
    %122 = arith.mulf %118, %121 : vector<8x32xf32>
    %c0_49 = arith.constant 0 : index
    %c0_50 = arith.constant 0 : index
    %c0_51 = arith.constant 0 : index
    %123 = vector.load %arg9[%c0_49, %c0_50, %c0_51] : memref<1x8x32xf32, #tpu.memory_space<vmem>>, vector<1x8x32xf32>
    %124 = vector.shape_cast %123 : vector<1x8x32xf32> to vector<8x32xf32>
    %125 = vector.shape_cast %122 : vector<8x32xf32> to vector<1x8x32xf32>
    tpu.vector_store %arg9[%c0_49, %c0_50, %c0_51], %125 {strides = array<i32>} : memref<1x8x32xf32, #tpu.memory_space<vmem>>, vector<1x8x32xf32>,
    return
  }
  func.func @transform_0(%arg0: i32, %arg1: i32) -> (i32, i32, i32) {
    %c0_i32 = arith.constant 0 : i32
    %c0_i32_0 = arith.constant 0 : i32
    %c0_i32_1 = arith.constant 0 : i32
    return %arg0, %c0_i32, %c0_i32_0 : i32, i32, i32
  }
  func.func @transform_1(%arg0: i32, %arg1: i32) -> (i32, i32, i32) {
    %c0_i32 = arith.constant 0 : i32
    %c0_i32_0 = arith.constant 0 : i32
    %c0_i32_1 = arith.constant 0 : i32
    return %arg0, %c0_i32, %c0_i32_0 : i32, i32, i32
  }
  func.func @transform_2(%arg0: i32, %arg1: i32) -> (i32, i32, i32) {
    %c0_i32 = arith.constant 0 : i32
    %c0_i32_0 = arith.constant 0 : i32
    return %arg0, %arg1, %c0_i32 : i32, i32, i32
  }
  func.func @transform_3(%arg0: i32, %arg1: i32) -> (i32, i32) {
    %c0_i32 = arith.constant 0 : i32
    %c0_i32_0 = arith.constant 0 : i32
    %c0_i32_1 = arith.constant 0 : i32
    return %c0_i32, %c0_i32_0 : i32, i32
  }
  func.func @transform_4(%arg0: i32, %arg1: i32) -> (i32, i32) {
    %c0_i32 = arith.constant 0 : i32
    %c0_i32_0 = arith.constant 0 : i32
    %c0_i32_1 = arith.constant 0 : i32
    return %c0_i32, %c0_i32_0 : i32, i32
  }
  func.func @transform_5(%arg0: i32, %arg1: i32) -> (i32, i32) {
    %c0_i32 = arith.constant 0 : i32
    %c0_i32_0 = arith.constant 0 : i32
    %c0_i32_1 = arith.constant 0 : i32
    return %c0_i32, %c0_i32_0 : i32, i32
  }
  func.func @transform_6(%arg0: i32, %arg1: i32) -> (i32, i32) {
    %c0_i32 = arith.constant 0 : i32
    %c0_i32_0 = arith.constant 0 : i32
    %c0_i32_1 = arith.constant 0 : i32
    return %c0_i32, %c0_i32_0 : i32, i32
  }
  func.func @transform_7(%arg0: i32, %arg1: i32) -> (i32, i32, i32) {
    %c0_i32 = arith.constant 0 : i32
    %c0_i32_0 = arith.constant 0 : i32
    return %arg0, %arg1, %c0_i32 : i32, i32, i32
  }
  func.func @transform_8(%arg0: i32, %arg1: i32) -> (i32, i32, i32, i32) {
    %c0_i32 = arith.constant 0 : i32
    %c0_i32_0 = arith.constant 0 : i32
    %c0_i32_1 = arith.constant 0 : i32
    return %arg0, %c0_i32, %arg1, %c0_i32_0 : i32, i32, i32, i32
  }
}

</mosaic_0001>

<bundles_post_ra>
// kernel: tpu_custom_call.1
= control target key start
LH: loop header
LB: loop body
LE: loop exit
PB: predicated region body
PF: predicated region fallthrough
CT: control target
= control target key end

     0   :  { %s2409_s0 = inlined_call_operand.vmem [shape: f32[2,8,32], index: 0, kind: input, shape index: {}]   ;;  %s2410_s1 = inlined_call_operand.hbm [shape: f32[2,1,8], index: 1, kind: input, shape index: {}]   ;;  %s2411_s2 = inlined_call_operand.vmem [shape: f32[2,8,1], index: 2, kind: input, shape index: {}]   ;;  %s2412_s3 = inlined_call_operand.hbm [shape: f32[6,32], index: 3, kind: input, shape index: {}]   ;;  %s2413_s4 = inlined_call_operand.vmem [shape: bf16[32,32], index: 4, kind: input, shape index: {}]   ;;  %s2414_s5 = inlined_call_operand.hbm [shape: bf16[32,64], index: 5, kind: input, shape index: {}]   ;;  %s2415_s6 = inlined_call_operand.hbm [shape: bf16[32,32], index: 6, kind: input, shape index: {}]   ;;  %s2416_s7 = inlined_call_operand.hbm [shape: f32[2,8,32], index: 7, kind: output, shape index: {0}]   ;;  %s2417_s8 = inlined_call_operand.hbm [shape: bf16[2,4,8,8], index: 8, kind: output, shape index: {1}]  }
   0x1   :  { %2425 = sst [smem:[#allocation23_spill]] %s2412_s3 }
   0x2   :  { %2426 = sst [smem:[#allocation24_spill]] %s2416_s7 }
   0x3   :  { %14 = vsyncpa [#allocation6], 0 }
   0x4   :  { %16 = vsyncpa [#allocation6 + $0x1], 0 }
   0x5   :  { %17 = vsyncpa [#allocation9], 0 }
   0x6   :  { %18 = vsyncpa [#allocation12], 0 }
   0x7   :  { %19 = vsyncpa [#allocation7], 0 }
   0x8   :  { %21 = vsyncpa [#allocation7 + $0x1], 0 }
   0x9   :  { %22 = vsyncpa [#allocation15], 0 }
   0xa   :  { %24 = vsyncpa [#allocation15 + $0x1], 0  ;;  %s1971_s27 = smov 0   ;;  %s1973_s28 = smov 0  }
   0xb   :  { %s1975_s29 = smov 0   ;;  %s1977_s30 = smov 0  }
   0xc   :  { %s1979_s9 = smov 0   ;;  %s1981_s10 = smov 0  }
   0xd LB: > { %2427 = sst [smem:[#allocation21_spill]] %s1883_s27  ;;  %s1380_s11 = sadd.s32 4294967295, %s1903_s10   ;;  %s1903_s10 = sphi %s1981_s10, %s30_s10   ;;  %s1899_s9 = sphi %s1979_s9, %s2452_s9   ;;  %s1895_s30 = sphi %s1977_s30, %s2451_s30   ;;  %s1891_s29 = sphi %s1975_s29, %s2450_s29   ;;  %s1887_s28 = sphi %s1973_s28, %s2449_s28   ;;  %s1883_s27 = sphi %s1971_s27, %s2448_s27  }
   0xe   : > { %s1381_s12 = sadd.s32 4294967294, %s1903_s10   ;;  %p88_p0 = scmp.ne.s32.totalorder %s1887_s28, %s1883_s27 }
   0xf   : > { %p2005_p1 = scmp.eq.s32.totalorder %s1380_s11, 0  ;;  %p2009_p2 = scmp.eq.s32.totalorder %s1380_s11, 1 }
  0x10   : > { %p232_p3 = scmp.eq.s32.totalorder %s1381_s12, 1  ;;  %p1382_p5 = scmp.ge.s32.totalorder %s1903_s10, 1 }
  0x11   : > { %s2428_s13 = scalar_select %p2005_p1, 1, 0 }
  0x12   : > { %s2429_s14 = scalar_select %p2009_p2, 1, 0 }
  0x13   : > { %p2015_p4 = por %p2005_p1, %p88_p0  ;;  %p2020_p6 = por %p232_p3, %p88_p0 }
  0x14   : > { %p267_p7 = scmp.lt.s32.totalorder %s1903_s10, 3  ;;  %s1905_s18 = smov [#allocation8]  }
  0x15   : > { %s2430_s15 = scalar_select %p2015_p4, 1, 0 }
  0x16   : > { %s2431_s16 = scalar_select %p2020_p6, 1, 0 }
  0x17   : > { %p2025_p8 = pnand %p1382_p5, %p267_p7  ;;  %s280_s19 = sshll.u32 %s1905_s18, 4  ;;  %s281_s19 = int_to_ptr.vmem [resolvable:$true] %s280_s19 }
  0x18   : > { %2432 = sst [smem:[#allocation22_spill]] %s2431_s16  ;;  %s1906_s20 = smov [#allocation10]  }
  0x19   : > { %s2433_s17 = scalar_select %p2025_p8, 1, 0 }
  0x1a   : > { %p1544_p10 = pneg %p2025_p8  ;;  %s293_s21 = sshll.u32 %s1906_s20, 4  ;;  %s2038_s21 = int_to_ptr.vmem [resolvable:$true] %s293_s21 }
  0x1b   : > { %s1907_s23 = smov [#allocation11]   ;;  %s2435_s3 = sld [smem:[#allocation23_spill]] }
  0x1c   : > { %p2034_p11 = pnand %p1544_p10, %p2005_p1  ;;  %s2040_s24 = sshll.u32 %s1907_s23, 4  ;;  %s307_s24 = int_to_ptr.vmem [resolvable:$true] %s2040_s24 }
  0x1e   : > { %p2050_p13 = pneg %p2034_p11 }
  0x21   : > { %s1667_s11 = scalar_lea.hbm %s2435_s3, 128 }
  0x22   : > { %p1668_p12 = scmp.ne.s32.totalorder %s2435_s3, %s1667_s11  ;;  %p1674_p5 = scmp.lt.u32.totalorder %s1667_s11, %s2435_s3 }
  0x24   : > { %p1670_p0 = pnand %p2050_p13, %p1668_p12 }
  0x26   : > { %p1671_p3 = pneg %p1670_p0 }
  0x28   : > { %p1676_p7 = pnand %p1674_p5, %p1671_p3 }
  0x2a   : > { %1679 = shalt.err (!%p1676_p7)
}
  0x2b   : > { %s1680_s25 = scalar_lea.vmem %s281_s19, 128  ;;  %p1688_p1 = scmp.lt.s32.totalorder %s281_s19, %s281_s19 }
  0x2c   : > { %p1681_p10 = scmp.ne.s32.totalorder %s281_s19, %s1680_s25  ;;  %p1689_p4 = scmp.lt.s32.totalorder %s1680_s25, %s1680_s25 }
  0x2e   : > { %p1683_p9 = pnand %p1681_p10, %p2050_p13  ;;  %p1690_p8 = por %p1689_p4, %p1688_p1 }
  0x30   : > { %p1684_p6 = pneg %p1683_p9 }
  0x32   : > { %p1691_p2 = pnand %p1690_p8, %p1684_p6 }
  0x34   : > { %1694 = shalt.err (!%p1691_p2)
}
  0x35   : > { %1547 = dma.hbm_to_vmem [thread:$0]  (!%p2034_p11), %s2435_s3, 128, %s281_s19, [#allocation9]  }
  0x36   : > { %s1695_s18 = scalar_lea.hbm %s2414_s5, 256 }
  0x37   : > { %p1696_p9 = scmp.ne.s32.totalorder %s2414_s5, %s1695_s18  ;;  %p1702_p2 = scmp.lt.u32.totalorder %s1695_s18, %s2414_s5 }
  0x39   : > { %p1698_p12 = pnand %p1696_p9, %p2050_p13 }
  0x3b   : > { %p1699_p1 = pneg %p1698_p12 }
  0x3d   : > { %p1704_p4 = pnand %p1702_p2, %p1699_p1 }
  0x3f   : > { %1707 = shalt.err (!%p1704_p4)
}
  0x40   : > { %s1708_s19 = scalar_lea.vmem %s2038_s21, 256  ;;  %p1716_p3 = scmp.lt.s32.totalorder %s2038_s21, %s2038_s21 }
  0x41   : > { %p1709_p6 = scmp.ne.s32.totalorder %s2038_s21, %s1708_s19  ;;  %p1717_p5 = scmp.lt.s32.totalorder %s1708_s19, %s1708_s19 }
  0x43   : > { %p1711_p8 = pnand %p1709_p6, %p2050_p13  ;;  %p1718_p7 = por %p1717_p5, %p1716_p3 }
  0x45   : > { %p1712_p0 = pneg %p1711_p8 }
  0x47   : > { %p1719_p10 = pnand %p1718_p7, %p1712_p0 }
  0x49   : > { %1722 = shalt.err (!%p1719_p10)
}
  0x4a   : > { %s1908_s27 = smov 64   ;;  %s1909_s7 = smov 4  }
  0x4b   : > { %1550 = dma.hbm_to_vmem [thread:$0]  (!%p2034_p11), %s2414_s5, 256, %s2038_s21, [#allocation9], %s1908_s27, %s1908_s27, %s1909_s7  }
  0x4c   : > { %s1723_s18 = scalar_lea.hbm %s2415_s6, 256 }
  0x4d   : > { %p1724_p9 = scmp.ne.s32.totalorder %s2415_s6, %s1723_s18  ;;  %p1730_p2 = scmp.lt.u32.totalorder %s1723_s18, %s2415_s6 }
  0x4f   : > { %p1726_p12 = pnand %p1724_p9, %p2050_p13 }
  0x51   : > { %p1727_p1 = pneg %p1726_p12 }
  0x53   : > { %p1732_p4 = pnand %p1730_p2, %p1727_p1 }
  0x55   : > { %1735 = shalt.err (!%p1732_p4)
}
  0x56   : > { %s1736_s26 = scalar_lea.vmem %s307_s24, 256  ;;  %p1744_p3 = scmp.lt.s32.totalorder %s307_s24, %s307_s24 }
  0x57   : > { %p1737_p6 = scmp.ne.s32.totalorder %s307_s24, %s1736_s26  ;;  %p1745_p5 = scmp.lt.s32.totalorder %s1736_s26, %s1736_s26 }
  0x59   : > { %p1739_p8 = pnand %p1737_p6, %p2050_p13  ;;  %p1746_p7 = por %p1745_p5, %p1744_p3 }
  0x5b   : > { %p1740_p0 = pneg %p1739_p8 }
  0x5d   : > { %p1747_p10 = pnand %p1746_p7, %p1740_p0 }
  0x5f   : > { %1750 = shalt.err (!%p1747_p10)
}
  0x60   : > { %1553 = dma.hbm_to_vmem [thread:$0]  (!%p2034_p11), %s2415_s6, 256, %s307_s24, [#allocation12], %s1908_s27, %s1908_s27, %s1909_s7  }
  0x61   : > { %s42_s3 = sadd.s32 1, %s1899_s9  ;;  %p82_p13 = scmp.ne.s32.totalorder %s1891_s29, %s1887_s28 }
  0x62   : > { %p44_p9 = scmp.ge.s32.totalorder %s42_s3, 2  ;;  %p83_p12 = scmp.eq.s32.totalorder %s1903_s10, 0 }
  0x63   : > { %s75_s22 = sadd.s32 1, %s1891_s29  ;;  %p2437_p1 = scmp.ne.s32.totalorder %s2429_s14, 0 }
  0x64   : > { %s2454_s3 = smov (%p44_p9, %s42_s3), 0  ;;  %p1568_p4 = scmp.lt.s32.totalorder %s1903_s10, 2 }
  0x65   : > { %p2115_p2 = por %p2437_p1, %p82_p13  ;;  %s327_s16 = sand.u32 1, %s1891_s29  }
  0x66   : > { %s72_s11 = ssub.s32 %s1899_s9, %s2454_s3  ;;  %p84_p6 = por %p83_p12, %p82_p13 }
  0x67   : > { %p73_p8 = scmp.eq.s32.totalorder %s72_s11, 0  ;;  %s1387_s24 = sshll.u32 %s1899_s9, 4 }
  0x68   : > { %s330_s27 = scalar_lea.vmem [#allocation5], %s327_s16  ;;  %s2132_s14 = scalar_lea.hbm %s2410_s1, %s1387_s24 }
  0x69   : > { %s337_s7 = sshll.u32 %s330_s27, 4  ;;  %p2136_p11 = pnand %p1568_p4, %p84_p6  ;;  %s2134_s7 = int_to_ptr.vmem [resolvable:$true] %s337_s7 }
  0x6a   : > { %s2127_s18 = scalar_select %p73_p8, %s1891_s29, %s75_s22  }
  0x6b   : > { %s328_s26 = scalar_lea.sflag [#allocation6], %s327_s16  ;;  %s1751_s21 = scalar_lea.hbm %s2132_s14, 16 }
  0x6c   : > { %p1752_p0 = scmp.ne.s32.totalorder %s2132_s14, %s1751_s21  ;;  %p1753_p3 = pneg %p2136_p11 }
  0x6d   : > { %s1756_s11 = scalar_lea.hbm %s2410_s1, 32  ;;  %p1757_p10 = scmp.lt.u32.totalorder %s2132_s14, %s2410_s1 }
  0x6e   : > { %p1754_p5 = pnand %p1753_p3, %p1752_p0  ;;  %p1758_p13 = scmp.lt.u32.totalorder %s1756_s11, %s1751_s21 }
  0x6f   : > { %p1760_p12 = scmp.lt.u32.totalorder %s1751_s21, %s2132_s14 }
  0x70   : > { %p1755_p7 = pneg %p1754_p5  ;;  %p1759_p9 = por %p1758_p13, %p1757_p10 }
  0x72   : > { %p1761_p1 = por %p1760_p12, %p1759_p9 }
  0x74   : > { %p1762_p4 = pnand %p1761_p1, %p1755_p7 }
  0x76   : > { %1765 = shalt.err (!%p1762_p4)
}
  0x77   : > { %s1766_s16 = scalar_lea.vmem %s2134_s7, 16  ;;  %s1910_s23 = smov [#allocation5]  }
  0x78   : > { %p1767_p6 = scmp.ne.s32.totalorder %s2134_s7, %s1766_s16  ;;  %s1771_s25 = sshll.u32 %s1910_s23, 4  ;;  %s1772_s25 = int_to_ptr.vmem [resolvable:$false] %s1771_s25 }
  0x79   : > { %s1773_s12 = scalar_lea.vmem %s1772_s25, 32  ;;  %p1774_p5 = scmp.lt.s32.totalorder %s2134_s7, %s1772_s25 }
  0x7a   : > { %p1769_p8 = pnand %p1767_p6, %p1753_p3  ;;  %p1775_p10 = scmp.lt.s32.totalorder %s1773_s12, %s1766_s16 }
  0x7c   : > { %p1770_p0 = pneg %p1769_p8  ;;  %p1776_p13 = por %p1775_p10, %p1774_p5 }
  0x7e   : > { %p1777_p9 = pnand %p1776_p13, %p1770_p0 }
  0x80   : > { %1780 = shalt.err (!%p1777_p9)
}
  0x81   : > { %1557 = dma.hbm_to_vmem [thread:$0]  (!%p2136_p11), %s2132_s14, 16, %s2134_s7, %s328_s26  }
  0x82   : > { %p2440_p7 = scmp.ne.s32.totalorder %s2433_s17, 0 }
  0x83   : > { %s2168_s21 = sand.u32 (!%p2440_p7), 1, %s1887_s28   ;;  %p2441_p3 = scmp.ne.s32.totalorder (!%p2440_p7), %s2430_s15, 0 }
  0x84   : > { %356 = sbr.rel (%p2440_p7) target bundleno = 1933 (0x78d), region = 48  ;;  %s359_s22 = scalar_lea.sflag (!%p2440_p7), [#allocation6], %s2168_s21 }
  0x85   : > { %s361_s11 = scalar_lea.vmem (!%p2440_p7), [#allocation5], %s2168_s21 }
  0x8b   : > { %1862 = dma.done.wait (%p2441_p3), %s359_s22, 16  }
  0x8c   : > { %1864 = vsyncadd (%p2441_p3), %s359_s22, 4294967280  ;;  %p2442_p12 = scmp.ne.s32.totalorder %s2428_s13, 0 }
  0x8e   : > { %1866 = dma.done.wait (%p2442_p12), [#allocation9], 384  }
  0x8f   : > { %1868 = vsyncadd (%p2442_p12), [#allocation9], 4294966912 }
  0x90   : > { %1870 = dma.done.wait (%p2442_p12), [#allocation12], 256  }
  0x91   : > { %1872 = vsyncadd (%p2442_p12), [#allocation12], 4294967040  ;;  %p421_p11 = scmp.lt.s32.totalorder %s1895_s30, 1  ;;  %vm439_vm0 = vcmask 261120   ;;  %v1641_v7 = vld [vmem:[#allocation10] sm:$0xff]   ;;  %v1911_v8 = vmov 0.0   ;;  %v454_v14 = vlaneseq }
  0x92   : > { %1454 = vmatprep.subr.bf16.mxu0 %v1911_v8  ;;  %vm1912_vm1 = vmmov 0   ;;  %v1642_v9 = vld [vmem:[#allocation10 + $0x8] sm:$0xff]   ;;  %1462 = vmatprep.subr.bf16.mxu1 %v1911_v8  ;;  %v1644_v11 = vld [vmem:[%s2413_s4 + $0x8] sm:$0xff]   ;;  %vm465_vm2 = vcmask 257024   ;;  %vm632_vm3 = vcmask 64512   ;;  %s1913_s16 = smov 112  }
  0x93   : > { %s2186_s17 = scalar_select %p421_p11, %s1895_s30, 1  ;;  %1458 = vmatprep.mubr.msk.bf16.mxu0 %vm1912_vm1, %v1911_v8  ;;  %1455 = vmatpush3.bf16.msra.mxu0 %v1641_v7  ;;  %v1643_v10 = vld [vmem:[%s2413_s4] sm:$0xff]   ;;  %v2216_v16 = vshrl.u32 %v454_v14, 7  ;;  %v2219_v18 = vld [vmem:[#allocation8] sm:$0x3f]  ;;  %vm696_vm4 = vcmask 1043456  }
  0x94   : > { %1456 = vmatprep.subr.bf16.mxu0 %v1911_v8  ;;  %1466 = vmatprep.mubr.msk.bf16.mxu1 %vm1912_vm1, %v1911_v8  ;;  %s1914_s23 = smov 120   ;;  %s1915_s25 = smov 104   ;;  %v1403_v58 = vld [vmem:[%s361_s11] ss:$0 sm:$0xff]  ;;  %vm691_vm5 = vcmask 60416   ;;  %vm1096_vm6 = vcmask 130048  }
  0x95   : > { %s1394_s15 = sshll.u32 %s2186_s17, 3  ;;  %1463 = vmatpush3.bf16.msra.mxu1 %v1643_v10  ;;  %v456_v17 = vsub.s32 0, %v2216_v16  ;;  %v461_v19 = vsub.s32 1, %v2216_v16  ;;  %v528_v28 = vsub.s32 3, %v2216_v16  ;;  %v564_v36 = vsub.s32 2, %v2216_v16  ;;  %s1916_s12 = smov 32  }
  0x96   : > { %s424_s19 = scalar_lea.vmem %s2409_s0, %s1394_s15  ;;  %1464 = vmatprep.subr.bf16.mxu1 %v1911_v8  ;;  %v535_v47 = vsub.s32 4, %v2216_v16  ;;  %s1917_s22 = smov 96   ;;  %vm1098_vm7 = vcmask 195584  }
  0x97   : > { %v2194_v0 = vld [vmem:[%s424_s19] sm:$0xff]  ;;  %1457 = vmatpush3.bf16.msra.mxu0 %v1642_v9  ;;  %v457_v20 = vrot.slane %v2219_v18, %v456_v17  ;;  %v462_v23 = vrot.slane %v2219_v18, %v461_v19  ;;  %v529_v29 = vrot.slane %v2219_v18, %v528_v28  ;;  %v565_v38 = vrot.slane %v2219_v18, %v564_v36  ;;  %s1393_s11 = sshll.u32 %s2168_s21, 4  ;;  %s1918_s14 = smov 8  }
  0x98   : > { %v440_v1 = vsel %vm439_vm0, %v2194_v0, 0.0  ;;  %1470 = vmatprep.subr.bf16.mxu0 %v1911_v8  ;;  %v536_v48 = vrot.slane %v2219_v18, %v535_v47  ;;  %s2285_s7 = scalar_lea.vmem [#allocation14], %s1393_s11  ;;  %s1920_s19 = smov 16  }
  0x99   : > { %441 = vadd.xlane.f32.xlu0 %v440_v1  ;;  %1465 = vmatpush3.bf16.msra.mxu1 %v1644_v11  ;;  %s431_s24 = scalar_lea.vmem %s2411_s2, %s1394_s15  ;;  %s1921_s27 = smov 24  }
  0x9a   : > { %1476 = vmatprep.subr.bf16.mxu1 %v1911_v8  ;;  %s1428_s17 = sshll.u32 %s1895_s30, 8  ;;  %s1207_s15 = sshll.u32 %s2285_s7, 4  ;;  %s2325_s15 = int_to_ptr.vmem [resolvable:$true] %s1207_s15 }
  0x9b   : > { %s1922_s11 = smov [#allocation14]  }
 0x126   : > { %v442_v2 = vpop.xlane.xlu0 %441 }
 0x127   : > { %v444_v3 = vmul.f32 0.03125, %v442_v2 }
 0x129   : > { %v445_v4 = vsub.f32 %v2194_v0, %v444_v3 }
 0x12b   : > { %v446_v5 = vmul.f32 %v445_v4, %v445_v4 }
 0x12d   : > { %v447_v6 = vsel %vm439_vm0, %v446_v5, 0.0 }
 0x12e   : > { %448 = vadd.xlane.f32.xlu0 %v447_v6 }
 0x1bb   : > { %v449_v12 = vpop.xlane.xlu0 %448 }
 0x1bc   : > { %v450_v13 = vmul.f32 0.03125, %v449_v12 }
 0x1be   : > { %v451_v15 = vadd.f32 1e-05, %v450_v13 }
 0x1c0   : > { %1649 = vrsqrt.f32 %v451_v15 }
 0x1ca   : > { %v1650_v21 = vpop.eup %1649 }
 0x1cb   : > { %v453_v22 = vmul.f32 %v1650_v21, %v445_v4 }
 0x1cd   : > { %v458_v24 = vmul.f32 %v457_v20, %v453_v22 }
 0x1cf   : > { %v463_v25 = vadd.f32 %v462_v23, %v458_v24 }
 0x1d1   : > { %v464_v26 = vpack.c.bf16 %v463_v25, %v463_v25 }
 0x1d3   : > { %466 = vst.msk [vmem:[#allocation2] sm:$0xf] %vm465_vm2, %v464_v26  ;;  %1459 = vmatmul.mubr.msk.bf16.vlgmr.msra.gmra.mrb[0].mxu0 %vm439_vm0, %v464_v26 }
 0x1d4   : > { %1472 = vmatprep.mubr.msk.bf16.mxu0 %vm1912_vm1, %v1911_v8 }
 0x1da   : > { %v557_v27 = vld [vmem:[#allocation2] sm:$0xf] }
 0x1db   : > { %1467 = vmatmul.mubr.msk.bf16.vlgmr.msra.gmra.mrb[0].mxu1 %vm439_vm0, %v557_v27 }
 0x1dc   : > { %1478 = vmatprep.mubr.msk.bf16.mxu1 %vm1912_vm1, %v1911_v8 }
 0x2a6   : > { %v2233_v30 = vpop.f32.mrb[0].mxu0 }
 0x2a7   : > { %v530_v31 = vadd.f32 %v529_v29, %v2233_v30  ;;  %v1460_v32 = vpop.f32.mrb[1].mxu0 }
 0x2a8   : > { %v523_v33 = vpop.f32.mrb[2].mxu0 }
 0x2a9   : > { %v531_v34 = vpack.c.bf16 %v530_v31, %v530_v31  ;;  %v1461_v35 = vpop.f32.mrb[3].mxu0 }
 0x2ab   : > { %532 = vst.msk [vmem:[#allocation3] sm:$0xf] %vm465_vm2, %v531_v34 }
 0x2ae   : > { %v616_v37 = vpop.f32.mrb[0].mxu1 }
 0x2af   : > { %v1468_v39 = vpop.f32.mrb[1].mxu1  ;;  %v617_v43 = vadd.f32 %v616_v37, %v565_v38 }
 0x2b0   : > { %v619_v40 = vpop.f32.mrb[2].mxu1 }
 0x2b1   : > { %v1469_v41 = vpop.f32.mrb[3].mxu1  ;;  %v622_v46 = vpack.c.bf16 %v617_v43, %v617_v43 }
 0x2b2   : > { %v623_v42 = vld [vmem:[#allocation3] sm:$0xf] }
 0x2b3   : > { %v637_v44 = vsel %vm632_vm3, %v623_v42, 0  ;;  %v1406_v45 = vcombine.low %v623_v42, %v623_v42 }
 0x2b4   : > { %1471 = vmatpush3.bf16.xpose.msra.mxu0 %v637_v44 }
 0x2b5   : > { %861 = vrot.lane.b32.xlu0 %v1406_v45, %s1913_s16  ;;  %746 = vrot.lane.b32.xlu1 %v1406_v45, %s1914_s23 }
 0x2b6   : > { %1482 = vmatprep.subr.bf16.mxu0 %v1911_v8 }
 0x2b9   : > { %741 = vrot.lane.b32.xlu1 %v622_v46, %s1914_s23 }
 0x2bb   : > { %1473 = vmatmul.mubr.msk.bf16.vlgmr.msra.gmra.mrb[4].mxu0 %vm632_vm3, %v622_v46 }
 0x2bc   : > { %1484 = vmatprep.mubr.msk.bf16.mxu0 %vm1912_vm1, %v1911_v8 }
 0x2bd   : > { %859 = vrot.lane.b32.xlu1 %v622_v46, %s1913_s16 }
 0x2c1   : > { %973 = vrot.lane.b32.xlu1 %v1406_v45, %s1915_s25 }
 0x2c5   : > { %971 = vrot.lane.b32.xlu1 %v622_v46, %s1915_s25 }
 0x2c9   : > { %538 = vrot.lane.b32.xlu1 %v536_v48, %s1916_s12  ;;  %s1179_s12 = scalar_lea.sflag [#allocation15], %s2168_s21 }
 0x327   : > { %v747_v49 = vpop.permute.xlu1 %746  ;;  %v862_v52 = vpop.permute.xlu0 %861 }
 0x328   : > { %v752_v50 = vsel %vm632_vm3, %v747_v49, 0  ;;  %v867_v54 = vsel %vm632_vm3, %v862_v52, 0 }
 0x329   : > { %1483 = vmatpush3.bf16.xpose.msra.mxu0 %v752_v50 }
 0x32a   : > { %1494 = vmatprep.subr.bf16.mxu0 %v1911_v8 }
 0x32b   : > { %v742_v51 = vpop.permute.xlu1 %741 }
 0x32f   : > { %v860_v53 = vpop.permute.xlu1 %859 }
 0x330   : > { %1485 = vmatmul.mubr.msk.bf16.vlgmr.msra.gmra.mrb[8].mxu0 %vm632_vm3, %v742_v51 }
 0x331   : > { %1495 = vmatpush3.bf16.xpose.msra.mxu0 %v867_v54  ;;  %1496 = vmatprep.mubr.msk.bf16.mxu0 %vm1912_vm1, %v1911_v8 }
 0x332   : > { %1506 = vmatprep.subr.bf16.mxu0 %v1911_v8 }
 0x333   : > { %v974_v55 = vpop.permute.xlu1 %973 }
 0x334   : > { %v979_v56 = vsel %vm632_vm3, %v974_v55, 0 }
 0x337   : > { %v972_v57 = vpop.permute.xlu1 %971 }
 0x338   : > { %1497 = vmatmul.mubr.msk.bf16.vlgmr.msra.gmra.mrb[12].mxu0 %vm632_vm3, %v860_v53 }
 0x339   : > { %1507 = vmatpush3.bf16.xpose.msra.mxu0 %v979_v56  ;;  %1508 = vmatprep.mubr.msk.bf16.mxu0 %vm1912_vm1, %v1911_v8 }
 0x33a   : > { %1518 = vmatprep.subr.bf16.mxu0 %v1911_v8 }
 0x33b   : > { %v539_v23 = vpop.permute.xlu1 %538 }
 0x33c   : > { %v541_v24 = vadd.f32 %v539_v23, %v2233_v30  ;;  %v1919_v23 = vmov 0  }
 0x33d   : > { %1639 = vset.pattern.permute.xlu1 %v1919_v23  ;;  %1640 = vset.pattern.permute.xlu0 %v1919_v23 }
 0x33e   : > { %v1427_v25 = vpack.c.bf16 %v541_v24, %v541_v24 }
 0x340   : > { %1509 = vmatmul.mubr.msk.bf16.vlgmr.msra.gmra.mrb[16].mxu0 %vm632_vm3, %v972_v57 }
 0x341   : > { %1522 = vmatprep.mubr.msk.bf16.mxu0 %vm1912_vm1, %v1911_v8 }
 0x38e   : > { %v673_v59 = vpop.f32.mrb[4].mxu0 }
 0x38f   : > { %v674_v60 = vadd.f32 %v1403_v58, %v673_v59  ;;  %v1474_v61 = vpop.f32.mrb[5].mxu0 }
 0x390   : > { %v676_v62 = vpop.f32.mrb[6].mxu0 }
 0x391   : > { %v1475_v63 = vpop.f32.mrb[7].mxu0  ;;  %v679_v1 = vsel %vm632_vm3, %v674_v60, -inf }
 0x392   : > { %680 = vmax.xlane.f32.xlu1 %v679_v1 }
 0x403   : > { %v788_v2 = vpop.f32.mrb[8].mxu0 }
 0x404   : > { %v789_v3 = vadd.f32 %v1403_v58, %v788_v2  ;;  %v1486_v4 = vpop.f32.mrb[9].mxu0 }
 0x405   : > { %v791_v5 = vpop.f32.mrb[10].mxu0 }
 0x406   : > { %v1487_v6 = vpop.f32.mrb[11].mxu0  ;;  %v794_v7 = vsel %vm632_vm3, %v789_v3, -inf }
 0x407   : > { %795 = vmax.xlane.f32.xlu0 %v794_v7 }
 0x40b   : > { %v903_v9 = vpop.f32.mrb[12].mxu0 }
 0x40c   : > { %v904_v10 = vadd.f32 %v1403_v58, %v903_v9  ;;  %v1498_v11 = vpop.f32.mrb[13].mxu0 }
 0x40d   : > { %v906_v12 = vpop.f32.mrb[14].mxu0 }
 0x40e   : > { %v1499_v13 = vpop.f32.mrb[15].mxu0  ;;  %v909_v14 = vsel %vm632_vm3, %v904_v10, -inf }
 0x40f   : > { %910 = vmax.xlane.f32.xlu1 %v909_v14  ;;  %v1647_v14 = vld [vmem:[#allocation11] sm:$0xff]  }
 0x410   : > { %1519 = vmatpush3.bf16.msra.mxu0 %v1647_v14 }
 0x411   : > { %1520 = vmatprep.subr.bf16.mxu0 %v1911_v8 }
 0x413   : > { %v1015_v15 = vpop.f32.mrb[16].mxu0 }
 0x414   : > { %v1016_v17 = vadd.f32 %v1403_v58, %v1015_v15  ;;  %v1510_v19 = vpop.f32.mrb[17].mxu0 }
 0x415   : > { %v1018_v20 = vpop.f32.mrb[18].mxu0 }
 0x416   : > { %v1511_v21 = vpop.f32.mrb[19].mxu0  ;;  %v1021_v22 = vsel %vm632_vm3, %v1016_v17, -inf }
 0x417   : > { %1022 = vmax.xlane.f32.xlu0 %v1021_v22  ;;  %v1648_v21 = vld [vmem:[#allocation11 + $0x8] sm:$0xff]  }
 0x418   : > { %1521 = vmatpush3.bf16.msra.mxu0 %v1648_v21 }
 0x41f   : > { %v681_v26 = vpop.xlane.xlu1 %680 }
 0x420   : > { %v682_v27 = vsub.f32 %v674_v60, %v681_v26  ;;  %546 = vrot.lane.b32.xlu1 %v1427_v25, %s1917_s22  ;;  %s1781_s22 = scalar_lea.vmem %s2325_s15, 256 }
 0x421   : > { %p1782_p1 = scmp.ne.s32.totalorder %s2325_s15, %s1781_s22 }
 0x422   : > { %v683_v28 = vmul.f32 1.442695, %v682_v27 }
 0x423   : > { %p1783_p4 = pnand %p1782_p1, %p2115_p2 }
 0x424   : > { %1651 = vpow2.f32 %v683_v28 }
 0x425   : > { %p1784_p6 = pneg %p1783_p4 }
 0x42e   : > { %v1652_v29 = vpop.eup %1651 }
 0x42f   : > { %v685_v31 = vsel %vm632_vm3, %v1652_v29, 0.0 }
 0x430   : > { %686 = vadd.xlane.f32.xlu0 %v685_v31 }
 0x494   : > { %v796_v32 = vpop.xlane.xlu0 %795 }
 0x495   : > { %v797_v33 = vsub.f32 %v789_v3, %v796_v32 }
 0x497   : > { %v798_v34 = vmul.f32 1.442695, %v797_v33 }
 0x499   : > { %1653 = vpow2.f32 %v798_v34 }
 0x49c   : > { %v911_v35 = vpop.xlane.xlu1 %910 }
 0x49d   : > { %v912_v36 = vsub.f32 %v904_v10, %v911_v35 }
 0x49f   : > { %v913_v37 = vmul.f32 1.442695, %v912_v36 }
 0x4a0   : > { %v547_v38 = vpop.permute.xlu1 %546 }
 0x4a1   : > { %1655 = vpow2.f32 %v913_v37  ;;  %549 = vst.msk [vmem:[#allocation4] sm:$0xf] %vm465_vm2, %v547_v38 }
 0x4a3   : > { %v1654_v30 = vpop.eup %1653 }
 0x4a4   : > { %v1023_v39 = vpop.xlane.xlu0 %1022  ;;  %v800_v40 = vsel %vm632_vm3, %v1654_v30, 0.0 }
 0x4a5   : > { %v1024_v41 = vsub.f32 %v1016_v17, %v1023_v39  ;;  %801 = vadd.xlane.f32.xlu0 %v800_v40 }
 0x4a7   : > { %v1025_v42 = vmul.f32 1.442695, %v1024_v41 }
 0x4a8   : > { %v624_v43 = vld [vmem:[#allocation4] sm:$0xf] }
 0x4a9   : > { %1657 = vpow2.f32 %v1025_v42  ;;  %v698_v44 = vsel %vm696_vm4, %v624_v43, 0  ;;  %v1409_v45 = vcombine.low %v624_v43, %v624_v43 }
 0x4aa   : > { %1477 = vmatpush3.bf16.msra.mxu1 %v698_v44 }
 0x4ab   : > { %v1656_v46 = vpop.eup %1655  ;;  %923 = vrot.lane.b32.xlu1 %v1409_v45, %s1913_s16  ;;  %1488 = vmatprep.subr.bf16.mxu1 %v1911_v8 }
 0x4ac   : > { %v915_v47 = vsel %vm632_vm3, %v1656_v46, 0.0 }
 0x4ad   : > { %916 = vadd.xlane.f32.xlu0 %v915_v47 }
 0x4af   : > { %1035 = vrot.lane.b32.xlu1 %v1409_v45, %s1915_s25  ;;  %s2323_s25 = scalar_lea.hbm %s2417_s8, %s1428_s17 }
 0x4b3   : > { %v1658_v48 = vpop.eup %1657 }
 0x4b4   : > { %v1027_v49 = vsel %vm632_vm3, %v1658_v48, 0.0 }
 0x4b5   : > { %1028 = vadd.xlane.f32.xlu0 %v1027_v49 }
 0x4bd   : > { %v687_v50 = vpop.xlane.xlu0 %686 }
 0x4be   : > { %1659 = vrcp.f32 %v687_v50 }
 0x4c8   : > { %v1660_v51 = vpop.eup %1659 }
 0x4c9   : > { %v689_v52 = vmul.f32 %v1660_v51, %v1652_v29  ;;  %v1165_v29 = vld [vmem:[%s431_s24] sm:$0xff] }
 0x4cb   : > { %811 = vrot.lane.b32.xlu0 %v1409_v45, %s1914_s23  ;;  %v690_v53 = vpack.c.bf16 %v689_v52, %v689_v52 }
 0x4cd   : > { %692 = vst.msk [vmem:[%s2285_s7] sm:$0xf] %vm691_vm5, %v690_v53  ;;  %1479 = vmatmul.mubr.msk.bf16.vlgmr.msra.gmra.mrb[4].mxu1 %vm632_vm3, %v690_v53 }
 0x4ce   : > { %1490 = vmatprep.mubr.msk.bf16.mxu1 %vm1912_vm1, %v1911_v8 }
 0x51d   : > { %v924_v1 = vpop.permute.xlu1 %923 }
 0x51e   : > { %v929_v3 = vsel %vm696_vm4, %v924_v1, 0 }
 0x521   : > { %v1036_v6 = vpop.permute.xlu1 %1035 }
 0x522   : > { %v1041_v9 = vsel %vm696_vm4, %v1036_v6, 0 }
 0x532   : > { %v802_v54 = vpop.xlane.xlu0 %801 }
 0x533   : > { %1661 = vrcp.f32 %v802_v54 }
 0x53a   : > { %v917_v55 = vpop.xlane.xlu0 %916 }
 0x53b   : > { %1663 = vrcp.f32 %v917_v55 }
 0x53d   : > { %v1662_v56 = vpop.eup %1661 }
 0x53e   : > { %v804_v57 = vmul.f32 %v1662_v56, %v1654_v30 }
 0x540   : > { %v805_v58 = vpack.c.bf16 %v804_v57, %v804_v57 }
 0x542   : > { %v1029_v59 = vpop.xlane.xlu0 %1028  ;;  %1408 = vst.msk [vmem:[%s2285_s7 + $0x4] sm:$0xf] %vm691_vm5, %v805_v58 }
 0x543   : > { %1665 = vrcp.f32 %v1029_v59 }
 0x545   : > { %v1664_v60 = vpop.eup %1663 }
 0x546   : > { %v919_v61 = vmul.f32 %v1664_v60, %v1656_v46  ;;  %v812_v62 = vpop.permute.xlu0 %811 }
 0x547   : > { %v817_v63 = vsel %vm696_vm4, %v812_v62, 0 }
 0x548   : > { %1489 = vmatpush3.bf16.msra.mxu1 %v817_v63  ;;  %v920_v2 = vpack.c.bf16 %v919_v61, %v919_v61 }
 0x549   : > { %1500 = vmatprep.subr.bf16.mxu1 %v1911_v8 }
 0x54a   : > { %1412 = vst.msk [vmem:[%s2285_s7 + $0x8] sm:$0xf] %vm691_vm5, %v920_v2 }
 0x54b   : > { %1491 = vmatmul.mubr.msk.bf16.vlgmr.msra.gmra.mrb[8].mxu1 %vm632_vm3, %v805_v58 }
 0x54c   : > { %1501 = vmatpush3.bf16.msra.mxu1 %v929_v3  ;;  %1502 = vmatprep.mubr.msk.bf16.mxu1 %vm1912_vm1, %v1911_v8 }
 0x54d   : > { %v1666_v4 = vpop.eup %1665  ;;  %1512 = vmatprep.subr.bf16.mxu1 %v1911_v8 }
 0x54e   : > { %v1031_v5 = vmul.f32 %v1666_v4, %v1658_v48 }
 0x550   : > { %v1032_v7 = vpack.c.bf16 %v1031_v5, %v1031_v5 }
 0x552   : > { %1415 = vst.msk [vmem:[%s2285_s7 + $0xc] sm:$0xf] %vm691_vm5, %v1032_v7 }
 0x553   : > { %1503 = vmatmul.mubr.msk.bf16.vlgmr.msra.gmra.mrb[12].mxu1 %vm632_vm3, %v920_v2 }
 0x554   : > { %1513 = vmatpush3.bf16.msra.mxu1 %v1041_v9  ;;  %1514 = vmatprep.mubr.msk.bf16.mxu1 %vm1912_vm1, %v1911_v8 }
 0x55b   : > { %1515 = vmatmul.mubr.msk.bf16.vlgmr.msra.gmra.mrb[16].mxu1 %vm632_vm3, %v1032_v7 }
 0x5a0   : > { %v734_v10 = vpop.f32.mrb[4].mxu1 }
 0x5a1   : > { %v1480_v11 = vpop.f32.mrb[5].mxu1 }
 0x5a2   : > { %v737_v12 = vpop.f32.mrb[6].mxu1 }
 0x5a3   : > { %v1481_v13 = vpop.f32.mrb[7].mxu1 }
 0x61e   : > { %v853_v15 = vpop.f32.mrb[8].mxu1 }
 0x61f   : > { %1084 = vrot.lane.b32.xlu1 %v853_v15, %s1918_s14  ;;  %v1492_v17 = vpop.f32.mrb[9].mxu1  ;;  %s1785_s14 = sshll.u32 %s1922_s11, 4  ;;  %s1786_s14 = int_to_ptr.vmem [resolvable:$false] %s1785_s14 }
 0x620   : > { %v856_v19 = vpop.f32.mrb[10].mxu1  ;;  %s1787_s7 = scalar_lea.vmem %s1786_s14, 512  ;;  %p1788_p8 = scmp.lt.s32.totalorder %s2325_s15, %s1786_s14 }
 0x621   : > { %v1493_v20 = vpop.f32.mrb[11].mxu1  ;;  %p1789_p0 = scmp.lt.s32.totalorder %s1787_s7, %s1781_s22 }
 0x623   : > { %p1790_p5 = por %p1789_p0, %p1788_p8 }
 0x625   : > { %p1791_p10 = pnand %p1790_p5, %p1784_p6 }
 0x626   : > { %v965_v22 = vpop.f32.mrb[12].mxu1 }
 0x627   : > { %1088 = vrot.lane.b32.xlu1 %v965_v22, %s1920_s19  ;;  %v1504_v24 = vpop.f32.mrb[13].mxu1 }
 0x628   : > { %v968_v25 = vpop.f32.mrb[14].mxu1 }
 0x629   : > { %v1505_v26 = vpop.f32.mrb[15].mxu1 }
 0x62e   : > { %v1077_v8 = vpop.f32.mrb[16].mxu1 }
 0x62f   : > { %1092 = vrot.lane.b32.xlu1 %v1077_v8, %s1921_s27  ;;  %v1516_v27 = vpop.f32.mrb[17].mxu1 }
 0x630   : > { %v1080_v28 = vpop.f32.mrb[18].mxu1 }
 0x631   : > { %v1517_v31 = vpop.f32.mrb[19].mxu1 }
 0x633   : > { %1168 = vperm.xlu1 %1639, %v1165_v29  }
 0x691   : > { %v1085_v32 = vpop.permute.xlu1 %1084 }
 0x692   : > { %v1095_v34 = vsel %vm632_vm3, %v734_v10, %v1085_v32 }
 0x699   : > { %v1089_v33 = vpop.permute.xlu1 %1088 }
 0x69a   : > { %v1097_v35 = vsel %vm1096_vm6, %v1095_v34, %v1089_v33 }
 0x6a1   : > { %v1093_v36 = vpop.permute.xlu1 %1092 }
 0x6a2   : > { %v1099_v37 = vsel %vm1098_vm7, %v1097_v35, %v1093_v36 }
 0x6a3   : > { %v1100_v38 = vpack.c.bf16 %v1099_v37, %v1099_v37 }
 0x6a5   : > { %1523 = vmatmul.mubr.msk.bf16.vlgmr.msra.gmra.mrb[20].mxu0 %vm439_vm0, %v1100_v38 }
 0x6a6   : > { %1794 = shalt.err (!%p1791_p10)
}
 0x6a7   : > { %s1795_s19 = scalar_lea.hbm %s2323_s25, 256  ;;  %s1799_s24 = scalar_lea.hbm %s2417_s8, 512 }
 0x6a8   : > { %p1796_p13 = scmp.ne.s32.totalorder %s2323_s25, %s1795_s19  ;;  %p1800_p3 = scmp.lt.u32.totalorder %s2323_s25, %s2417_s8 }
 0x6a9   : > { %p1801_p12 = scmp.lt.u32.totalorder %s1799_s24, %s1795_s19  ;;  %p1803_p1 = scmp.lt.u32.totalorder %s1795_s19, %s2323_s25 }
 0x6aa   : > { %p1797_p9 = pnand %p1796_p13, %p2115_p2 }
 0x6ab   : > { %p1802_p11 = por %p1801_p12, %p1800_p3 }
 0x6ac   : > { %p1798_p7 = pneg %p1797_p9 }
 0x6ad   : > { %p1804_p4 = por %p1803_p1, %p1802_p11 }
 0x6af   : > { %p1805_p6 = pnand %p1804_p4, %p1798_p7 }
 0x6b1   : > { %1808 = shalt.err (!%p1805_p6)
}
 0x6b2   : > { %s1923_s16 = smov 64   ;;  %s1924_s23 = smov 4   ;;  %v1107_v30 = vsub.s32 5, %v2216_v16  ;;  %v1169_v44 = vpop.permute.xlu1 %1168 }
 0x6b3   : > { %1541 = dma.vmem_to_hbm [thread:$0]  (%p2115_p2), %s2325_s15, 256, %s2323_s25, %s1179_s12, %s1923_s16, %s1923_s16, %s1924_s23  }
 0x6b4   : > { %s1392_s22 = sshll.u32 %s2168_s21, 3  ;;  %v1108_v39 = vrot.slane %v2219_v18, %v1107_v30  ;;  %s1422_s11 = sshll.u32 %s1895_s30, 7 }
 0x6b5   : > { %s413_s14 = scalar_lea.vmem [#allocation13], %s1392_s22  ;;  %s2443_s12 = sld [smem:[#allocation24_spill]] }
 0x6b6   : > { %s1193_s7 = sshll.u32 %s413_s14, 4  ;;  %s1174_s13 = scalar_lea.sflag [#allocation7], %s2168_s21  ;;  %s2361_s7 = int_to_ptr.vmem [resolvable:$true] %s1193_s7 }
 0x6b7   : > { %s1809_s30 = scalar_lea.vmem %s2361_s7, 128  ;;  %s1925_s26 = smov [#allocation13]  }
 0x6b8   : > { %p1810_p8 = scmp.ne.s32.totalorder %s2361_s7, %s1809_s30  ;;  %s1813_s24 = sshll.u32 %s1925_s26, 4  ;;  %s1814_s24 = int_to_ptr.vmem [resolvable:$false] %s1813_s24 }
 0x6b9   : > { %s1815_s27 = scalar_lea.vmem %s1814_s24, 256  ;;  %p1816_p10 = scmp.lt.s32.totalorder %s2361_s7, %s1814_s24 }
 0x6ba   : > { %p1811_p0 = pnand %p1810_p8, %p2115_p2  ;;  %p1817_p13 = scmp.lt.s32.totalorder %s1815_s27, %s1809_s30 }
 0x6bb   : > { %s2359_s19 = scalar_lea.hbm %s2443_s12, %s1422_s11 }
 0x6bc   : > { %p1812_p5 = pneg %p1811_p0  ;;  %p1818_p9 = por %p1817_p13, %p1816_p10 }
 0x6be   : > { %p1819_p7 = pnand %p1818_p9, %p1812_p5 }
 0x778   : > { %v1158_v40 = vpop.f32.mrb[20].mxu0 }
 0x779   : > { %v1159_v41 = vadd.f32 %v1158_v40, %v1108_v39  ;;  %v1524_v42 = vpop.f32.mrb[21].mxu0 }
 0x77a   : > { %v1161_v43 = vpop.f32.mrb[22].mxu0 }
 0x77b   : > { %v1525_v45 = vpop.f32.mrb[23].mxu0  ;;  %v1164_v46 = vadd.f32 %v1159_v41, %v2194_v0 }
 0x77d   : > { %v1171_v47 = vmul.f32 %v1169_v44, %v1164_v46 }
 0x77f   : > { %1172 = vst.msk [vmem:[%s413_s14] sm:$0xff] %vm439_vm0, %v1171_v47 }
 0x780   : > { %1822 = shalt.err (!%p1819_p7)
}
 0x781   : > { %s1823_s21 = scalar_lea.hbm %s2359_s19, 128  ;;  %s1827_s23 = scalar_lea.hbm %s2443_s12, 256 }
 0x782   : > { %p1824_p3 = scmp.ne.s32.totalorder %s2359_s19, %s1823_s21  ;;  %p1828_p1 = scmp.lt.u32.totalorder %s2359_s19, %s2443_s12 }
 0x783   : > { %p1829_p4 = scmp.lt.u32.totalorder %s1827_s23, %s1823_s21  ;;  %p1831_p8 = scmp.lt.u32.totalorder %s1823_s21, %s2359_s19 }
 0x784   : > { %p1825_p12 = pnand %p1824_p3, %p2115_p2 }
 0x785   : > { %p1830_p6 = por %p1829_p4, %p1828_p1 }
 0x786   : > { %p1826_p11 = pneg %p1825_p12 }
 0x787   : > { %p1832_p0 = por %p1831_p8, %p1830_p6 }
 0x789   : > { %p1833_p5 = pnand %p1832_p0, %p1826_p11 }
 0x78b   : > { %1836 = shalt.err (!%p1833_p5)
}
 0x78c   : > { %1540 = dma.vmem_to_hbm [thread:$0]  (%p2115_p2), %s2361_s7, 128, %s2359_s19, %s1174_s13  }
 0x78d PF: > { %s2444_s14 = sld [smem:[#allocation21_spill]]  ;;  %s2445_s15 = sld [smem:[#allocation22_spill]] }
 0x78e   : > { %p2447_p13 = scmp.ge.s32.totalorder %s1903_s10, 2 }
 0x793   : > { %s1222_s25 = sand.u32 1, %s2444_s14   ;;  %p2446_p10 = scmp.ne.s32.totalorder %s2445_s15, 0 }
 0x794   : > { %s1223_s30 = scalar_lea.sflag [#allocation7], %s1222_s25 }
 0x795   : > { %p1559_p9 = pnand %p2447_p13, %p2446_p10 }
 0x797   : > { %1874 = dma.done.wait (!%p1559_p9), %s1223_s30, 128  }
 0x798   : > { %1876 = vsyncadd (!%p1559_p9), %s1223_s30, 4294967168  ;;  %s1232_s26 = scalar_lea.sflag [#allocation15], %s1222_s25 }
 0x799   : > { %1878 = dma.done.wait (!%p1559_p9), %s1232_s26, 256  }
 0x79a   : > { %1880 = vsyncadd (!%p1559_p9), %s1232_s26, 4294967040  ;;  %s30_s10 = sadd.s32 1, %s1903_s10   ;;  %s2448_s27 = smov %s1887_s28 }
 0x79b   : > { %p27_p7 = scmp.ge.s32.totalorder %s30_s10, 4   ;;  %s2449_s28 = smov %s1891_s29 }
 0x79c   : > { %s2450_s29 = smov %s2127_s18  ;;  %s2451_s30 = smov %s1899_s9 }
 0x79d   : > { %s2452_s9 = smov %s2454_s3  ;;  %29 = sbr.rel (!%p27_p7) target bundleno = 13 (0xd), region = 137 }
 0x7a4   :  { %1237 = vsyncpa [#allocation6], 1 }
 0x7a5   :  { %1239 = vsyncpa [#allocation6 + $0x1], 1 }
 0x7a6   :  { %1240 = vsyncpa [#allocation9], 1 }
 0x7a7   :  { %1241 = vsyncpa [#allocation12], 1 }
 0x7a8   :  { %1242 = vsyncpa [#allocation7], 1 }
 0x7a9   :  { %1244 = vsyncpa [#allocation7 + $0x1], 1 }
 0x7aa   :  { %1245 = vsyncpa [#allocation15], 1 }
 0x7ab   :  { %1247 = vsyncpa [#allocation15 + $0x1], 1 }

</bundles_post_ra>
